<compile_context>
chip_gen: v5e
topology: v5e:2x2
jax: 0.10.0
libtpu: 0.0.40
codegen_flags: <defaults>
</compile_context>

<pallas_src>
import math

import jax
import jax.numpy as jnp
import numpy as np
from jax import lax
from jax.experimental import pallas as pl
from jax.experimental.pallas import tpu as pltpu

_PI = 3.14159265  # same constant the PyTorch module uses


def _round_up(v, m):
    return ((v + m - 1) // m) * m


def _row_renorm(a, *, return_norm=False):
    """torch: a.renorm(2, 0, 1e-5).mul(1e5) -> rows with norm > 1e-5 become ~unit rows.

    Uses rsqrt (one EUP op) instead of sqrt+divide; torch's +1e-7 denominator eps only
    perturbs the scale by O(1e-7) relative and is dropped.
    """
    sumsq = jnp.sum(a * a, axis=1, keepdims=True)
    factor = jnp.where(sumsq > 1e-10, lax.rsqrt(jnp.maximum(sumsq, 1e-30)), 1e5)
    unit = a * factor
    if return_norm:
        return unit, jnp.sqrt(sumsq)
    return unit


def _margin_diff(diff, m1, m2):
    """coef * cos(m1*theta + m2) - 2k  with k = floor((m1*theta + m2)/pi), theta = acos(diff)."""
    if m1 == 1.0:
        # Closed form that avoids acos()/cos() transcendentals inside the kernel:
        # cos(theta + m2) = cos(theta)cos(m2) - sin(theta)sin(m2), sin(theta) >= 0 on [0, pi];
        # k = floor((theta + m2)/pi) reduces to a threshold test on cos(theta).
        sin_t = jnp.sqrt(jnp.maximum(1.0 - diff * diff, 0.0))
        cos_angle = diff * math.cos(m2) - sin_t * math.sin(m2)
        q = m2 / _PI
        qf = math.floor(q)
        r = q - qf
        thr = math.cos(_PI * (1.0 - r))
        k = qf + jnp.where(diff <= thr, 1.0, 0.0)
    else:
        # TODO(synk): general m1 relies on Mosaic lowering of arccos/cos transcendentals.
        angle = jnp.arccos(diff) * m1 + m2
        k = jnp.floor(angle / _PI)
        cos_angle = jnp.cos(angle)
    k_mod2 = k - 2.0 * jnp.floor(k * 0.5)
    coef = jnp.where(k_mod2 == 0.0, 1.0, -1.0)  # coef = (k+1)%2 with 0 -> -1
    return coef * cos_angle - 2.0 * k


def _build_kernel(*, training, scale, m1, m2, m3, input_norm, support_vector,
                  t, adaptive, combine, inv_1p_lamb, tile_c, mxu_dtype):
    margin_active = training and (m1 != 1.0 or m2 != 0.0 or m3 != 0.0)

    def kernel(x_ref, w_ref, wt_ref, tgt_ref, out_ref, ew_ref):
        j = pl.program_id(0)   # class (C) tile  -- outer, "parallel" (megacore shard)
        i = pl.program_id(1)   # batch (B) tile  -- inner, "arbitrary" (sequential)

        # Renormalize this weight tile once per class tile; cache the bf16 MXU operand in
        # VMEM scratch and reuse it across all batch tiles (w block index is constant in i,
        # so the HBM->VMEM copy is also not repeated).
        @pl.when(i == 0)
        def _():
            w = w_ref[...].astype(jnp.float32)
            ew_ref[...] = _row_renorm(w).astype(mxu_dtype)

        x = x_ref[...].astype(jnp.float32)
        if input_norm:
            ex = _row_renorm(x)
        else:
            ex, x_norm = _row_renorm(x, return_norm=True)

        # cos_theta tile on the MXU: bf16 operands, f32 accumulation.
        cos = lax.dot_general(ex.astype(mxu_dtype), ew_ref[...],
                              (((1,), (1,)), ((), ())),
                              preferred_element_type=jnp.float32)

        if training:
            cos = jnp.clip(cos, -1.0, 1.0)
            if margin_active:
                # Target-column cosine via a direct f32 dot with the gathered, renormalized
                # target weight rows: O(TB*D) instead of an O(TB*C) one-hot XLU reduce, and
                # independent of the class tile (required for correct C tiling).
                ewt = _row_renorm(wt_ref[...].astype(jnp.float32))
                diff = jnp.clip(jnp.sum(ex * ewt, axis=1, keepdims=True), -1.0, 1.0)
                output0 = diff
                if m1 != 1.0 or m2 != 0.0:
                    diff = _margin_diff(diff, m1, m2)
                diff = diff - m3
                if combine:
                    scat = output0 - output0 * inv_1p_lamb + diff * inv_1p_lamb
                else:
                    scat = diff

                # Scatter the margin value into this tile's slice of the target column.
                col = lax.broadcasted_iota(jnp.int32, cos.shape, 1) + j * tile_c
                onehot = col == tgt_ref[...]
                cos = jnp.where(onehot, scat, cos)

                if support_vector:
                    # gt_score (gathered after the scatter in torch) == scat, a per-row
                    # scalar, so the hard-example reweighting is valid in every C tile.
                    mask = cos > scat
                    if adaptive:
                        cos = jnp.where(mask, (t + 1.0) * cos + t, cos)
                    else:
                        cos = jnp.where(mask, cos + t, cos)
        else:
            cos = jnp.clip(cos, -1.0 + 1e-6, 1.0 - 1e-6)

        if input_norm:
            out_ref[...] = cos * scale
        else:
            out_ref[...] = cos * x_norm

    return kernel


def combine_margin_linear(x, weight, target=None, *, training=True, scale=1.0,
                          m1=1.0, m2=0.0, m3=0.0, input_norm=True,
                          support_vector=False, t=0.2, adaptive=False,
                          combine=False, base=1000, gamma=1.5e-5, power=5,
                          lambda_min=5, iteration=0,
                          tile_b=128, tile_c=512,
                          mxu_dtype=jnp.bfloat16, weight_stream_dtype=None):
    """Forward pass of CombineMarginLinear (calculate_loss=False).

    tile_b / tile_c: batch / class tile sizes (rounded to 8 / 128).  Pass
    weight_stream_dtype=jnp.bfloat16 on v7x to halve weight HBM traffic.
    """
    # TODO(synk): calculate_loss=True (cross-entropy head) is not implemented in-kernel.
    B, D = x.shape
    C, D2 = weight.shape
    assert D == D2
    if target is None:
        target = jnp.zeros((B,), jnp.int32)
    target = target.astype(jnp.int32)

    # Tile sizes: lane-dense output (TC multiple of 128), f32 sublane tile (TB multiple of 8).
    tb = _round_up(min(tile_b, _round_up(B, 8)), 8)
    tc = _round_up(min(tile_c, _round_up(C, 128)), 128)
    Bp = _round_up(B, tb)
    Cp = _round_up(C, tc)

    w_dtype = weight_stream_dtype or jnp.float32
    x_p = jnp.zeros((Bp, D), jnp.float32).at[:B].set(x.astype(jnp.float32))
    w_p = jnp.zeros((Cp, D), w_dtype).at[:C].set(weight.astype(w_dtype))
    # Gathered target weight rows (full precision) feeding the in-kernel target-column dot.
    w_tgt = jnp.zeros((Bp, D), jnp.float32).at[:B].set(
        jnp.take(weight.astype(jnp.float32), target, axis=0))
    tgt_p = jnp.zeros((Bp, 1), jnp.int32).at[:B, 0].set(target)

    # lamb only matters when combine=True; computed from the (static) iteration counter.
    lamb = max(lambda_min, base / (1.0 + gamma * iteration) ** power)
    inv_1p_lamb = 1.0 / (1.0 + lamb)

    kernel = _build_kernel(training=training, scale=float(scale), m1=float(m1),
                           m2=float(m2), m3=float(m3), input_norm=bool(input_norm),
                           support_vector=bool(support_vector), t=float(t),
                           adaptive=bool(adaptive), combine=bool(combine),
                           inv_1p_lamb=float(inv_1p_lamb), tile_c=tc,
                           mxu_dtype=mxu_dtype)

    grid = (Cp // tc, Bp // tb)   # class tiles outer, batch tiles inner

    out = pl.pallas_call(
        kernel,
        out_shape=jax.ShapeDtypeStruct((Bp, Cp), jnp.float32),
        grid=grid,
        in_specs=[
            pl.BlockSpec((tb, D), lambda j, i: (i, 0)),   # x
            pl.BlockSpec((tc, D), lambda j, i: (j, 0)),   # weight (streamed, double-buffered)
            pl.BlockSpec((tb, D), lambda j, i: (i, 0)),   # weight[target]
            pl.BlockSpec((tb, 1), lambda j, i: (i, 0)),   # target indices (int32)
        ],
        out_specs=pl.BlockSpec((tb, tc), lambda j, i: (i, j)),   # lane-dense output tile
        scratch_shapes=[pltpu.VMEM((tc, D), mxu_dtype)],         # cached renormalized weights
        compiler_params=pltpu.CompilerParams(
            dimension_semantics=("parallel", "arbitrary"),
            # 32 MiB is safe on every generation (v7x default scoped VMEM) and leaves
            # ample headroom for the default tile sizes.
            vmem_limit_bytes=32 * 1024 * 1024,
        ),
    )(x_p, w_p, w_tgt, tgt_p)

    return out[:B, :C]


def reference_forward(x, w, target, *, training, scale, m1, m2, m3, input_norm,
                      support_vector, t, adaptive, combine, base, gamma, power,
                      lambda_min, iteration):
    """Pure-JAX mirror of the PyTorch forward (sanity check, full f32)."""
    def renorm(a):
        n = jnp.sqrt(jnp.sum(a * a, axis=1, keepdims=True))
        factor = jnp.where(n > 1e-5, 1e-5 / (n + 1e-7), 1.0)
        return a * (factor * 1e5), n

    ex, x_norm = renorm(x)
    ew, _ = renorm(w)
    cos = jnp.matmul(ex, ew.T, precision=lax.Precision.HIGHEST)
    if training:
        cos = jnp.clip(cos, -1.0, 1.0)
        if m1 != 1.0 or m2 != 0.0 or m3 != 0.0:
            tv = target[:, None]
            diff = jnp.take_along_axis(cos, tv, axis=1)
            output0 = diff * 1.0
            if m1 != 1.0 or m2 != 0.0:
                angle = jnp.arccos(diff) * m1 + m2
                k = jnp.floor(angle / _PI)
                coef = jnp.where(jnp.mod(k + 1.0, 2.0) == 0.0, -1.0, 1.0)
                diff = coef * jnp.cos(angle) - 2.0 * k
            diff = diff - m3
            if combine:
                lamb = max(lambda_min, base / (1.0 + gamma * iteration) ** power)
                scat = output0 - output0 / (1.0 + lamb) + diff / (1.0 + lamb)
            else:
                scat = diff
            onehot = lax.broadcasted_iota(jnp.int32, cos.shape, 1) == tv
            cos = jnp.where(onehot, scat, cos)
            if support_vector:
                gt = jnp.take_along_axis(cos, tv, axis=1)
                mask = cos > gt
                if adaptive:
                    cos = jnp.where(mask, (t + 1.0) * cos + t, cos)
                else:
                    cos = jnp.where(mask, cos + t, cos)
    else:
        cos = jnp.clip(cos, -1.0 + 1e-6, 1.0 - 1e-6)
    return cos * scale if input_norm else cos * x_norm


if __name__ == "__main__":
    B, IN_CH, OUT_CH = 16, 128, 512
    key = jax.random.PRNGKey(0)
    kx, kw, kt = jax.random.split(key, 3)

    x = jax.random.normal(kx, (B, IN_CH), dtype=jnp.float32)
    # weight ~ Normal(0, 0.01), matching Parameter(out_channels, in_channels).normal_(0, 0.01)
    weight = 0.01 * jax.random.normal(kw, (OUT_CH, IN_CH), dtype=jnp.float32)
    target = jax.random.randint(kt, (B,), 0, OUT_CH, dtype=jnp.int32)

    common = dict(base=1000, gamma=1.5e-5, power=5, lambda_min=5, iteration=2_000_000)
    # Small tiles so the test exercises multiple class tiles (per-tile scatter) and
    # multiple batch tiles (normalized-weight scratch reuse under pl.when(i == 0)).
    tiles = dict(tile_b=8, tile_c=256)

    # 1) main training path: angular + additive-cosine margin, input_norm scaling.
    cfg1 = dict(training=True, scale=30.0, m1=1.0, m2=0.3, m3=0.1, input_norm=True,
                support_vector=False, t=0.2, adaptive=False, combine=False, **common)
    out1 = jax.block_until_ready(combine_margin_linear(x, weight, target, **tiles, **cfg1))
    ref1 = reference_forward(x, weight, target, **cfg1)
    # Loose tolerance: the kernel uses bf16 MXU operands (f32 accumulation).
    np.testing.assert_allclose(np.asarray(out1), np.asarray(ref1), atol=1e-1, rtol=1e-1)

    # 2) eval path (clamp + scale only).
    cfg2 = dict(training=False, scale=30.0, m1=1.0, m2=0.3, m3=0.1, input_norm=True,
                support_vector=False, t=0.2, adaptive=False, combine=False, **common)
    out2 = jax.block_until_ready(combine_margin_linear(x, weight, target, **tiles, **cfg2))
    ref2 = reference_forward(x, weight, target, **cfg2)
    np.testing.assert_allclose(np.asarray(out2), np.asarray(ref2), atol=1e-1, rtol=1e-1)

    # 3) support_vector + combine + x-norm scaling.  The hard-example mask is a discrete
    #    comparison against the scattered target score, so bf16-MXU rounding can flip a
    #    handful of boundary entries vs. the f32 reference; require >=98% elementwise
    #    agreement instead of a strict allclose.
    cfg3 = dict(training=True, scale=30.0, m1=1.0, m2=0.2, m3=0.05, input_norm=False,
                support_vector=True, t=0.2, adaptive=True, combine=True, **common)
    out3 = jax.block_until_ready(combine_margin_linear(x, weight, target, **tiles, **cfg3))
    ref3 = reference_forward(x, weight, target, **cfg3)
    close = np.isclose(np.asarray(out3), np.asarray(ref3), atol=1e-1, rtol=1e-1)
    assert np.isfinite(np.asarray(out3)).all()
    assert close.mean() > 0.98, f"support_vector path: only {close.mean():.4f} of entries match"

    print("KERNEL_OK")
</pallas_src>

<mosaic_0001>
module attributes {stable_mosaic.version = 11 : i64} {
  func.func @kernel(%arg0: i32, %arg1: i32, %arg2: memref<8x128xf32, #tpu.memory_space<vmem>>, %arg3: memref<256x128xf32, #tpu.memory_space<vmem>>, %arg4: memref<8x128xf32, #tpu.memory_space<vmem>>, %arg5: memref<8x1xi32, #tpu.memory_space<vmem>>, %arg6: memref<8x256xf32, #tpu.memory_space<vmem>>, %arg7: memref<256x128xbf16, #tpu.memory_space<vmem>>) attributes {dimension_semantics = [#tpu.dimension_semantics<parallel>, #tpu.dimension_semantics<arbitrary>], iteration_bounds = array<i64: 2, 2>, scalar_prefetch = 0 : i64, scratch_operands = 1 : i64, tpu.core_type = #tpu.core_type<tc>, window_params = [{transform_indices = @transform_0, window_bounds = array<i64: 8, 128>}, {transform_indices = @transform_1, window_bounds = array<i64: 256, 128>}, {transform_indices = @transform_2, window_bounds = array<i64: 8, 128>}, {transform_indices = @transform_3, window_bounds = array<i64: 8, 1>}, {transform_indices = @transform_4, window_bounds = array<i64: 8, 256>}]} {
    %c0_i32 = arith.constant 0 : i32
    %0 = arith.cmpi eq, %arg1, %c0_i32 : i32
    %1 = arith.extui %0 : i1 to i32
    %c0_i32_0 = arith.constant 0 : i32
    %2 = arith.cmpi ne, %1, %c0_i32_0 : i32
    scf.if %2 {
      %c0_39 = arith.constant 0 : index
      %c0_40 = arith.constant 0 : index
      %91 = vector.load %arg3[%c0_39, %c0_40] : memref<256x128xf32, #tpu.memory_space<vmem>>, vector<256x128xf32>
      %92 = arith.mulf %91, %91 : vector<256x128xf32>
      %cst_41 = arith.constant dense<0.000000e+00> : vector<256xf32>
      %93 = vector.multi_reduction <add>, %92, %cst_41 [1] : vector<256x128xf32> to vector<256xf32>
      %94 = vector.shape_cast %93 : vector<256xf32> to vector<256x1xf32>
      %cst_42 = arith.constant 1.000000e-10 : f32
      %95 = vector.broadcast %cst_42 : f32 to vector<256x1xf32>
      %96 = arith.cmpf ogt, %94, %95 : vector<256x1xf32>
      %cst_43 = arith.constant 1.000000e-30 : f32
      %97 = vector.broadcast %cst_43 : f32 to vector<256x1xf32>
      %98 = arith.maximumf %94, %97 : vector<256x1xf32>
      %99 = math.rsqrt %98 : vector<256x1xf32>
      %cst_44 = arith.constant 1.000000e+05 : f32
      %100 = vector.broadcast %cst_44 : f32 to vector<256x1xf32>
      %101 = arith.select %96, %99, %100 : vector<256x1xi1>, vector<256x1xf32>
      %102 = vector.broadcast %101 : vector<256x1xf32> to vector<256x128xf32>
      %103 = arith.mulf %91, %102 : vector<256x128xf32>
      %104 = arith.truncf %103 : vector<256x128xf32> to vector<256x128xbf16>
      %c0_45 = arith.constant 0 : index
      %c0_46 = arith.constant 0 : index
      %105 = vector.load %arg7[%c0_45, %c0_46] : memref<256x128xbf16, #tpu.memory_space<vmem>>, vector<256x128xbf16>
      tpu.vector_store %arg7[%c0_45, %c0_46], %104 {strides = array<i32>} : memref<256x128xbf16, #tpu.memory_space<vmem>>, vector<256x128xbf16>,
    } else {
    }
    %c0 = arith.constant 0 : index
    %c0_1 = arith.constant 0 : index
    %3 = vector.load %arg2[%c0, %c0_1] : memref<8x128xf32, #tpu.memory_space<vmem>>, vector<8x128xf32>
    %4 = arith.mulf %3, %3 : vector<8x128xf32>
    %cst = arith.constant dense<0.000000e+00> : vector<8xf32>
    %5 = vector.multi_reduction <add>, %4, %cst [1] : vector<8x128xf32> to vector<8xf32>
    %6 = vector.shape_cast %5 : vector<8xf32> to vector<8x1xf32>
    %cst_2 = arith.constant 1.000000e-10 : f32
    %7 = vector.broadcast %cst_2 : f32 to vector<8x1xf32>
    %8 = arith.cmpf ogt, %6, %7 : vector<8x1xf32>
    %cst_3 = arith.constant 1.000000e-30 : f32
    %9 = vector.broadcast %cst_3 : f32 to vector<8x1xf32>
    %10 = arith.maximumf %6, %9 : vector<8x1xf32>
    %11 = math.rsqrt %10 : vector<8x1xf32>
    %cst_4 = arith.constant 1.000000e+05 : f32
    %12 = vector.broadcast %cst_4 : f32 to vector<8x1xf32>
    %13 = arith.select %8, %11, %12 : vector<8x1xi1>, vector<8x1xf32>
    %14 = vector.broadcast %13 : vector<8x1xf32> to vector<8x128xf32>
    %15 = arith.mulf %3, %14 : vector<8x128xf32>
    %16 = arith.truncf %15 : vector<8x128xf32> to vector<8x128xbf16>
    %c0_5 = arith.constant 0 : index
    %c0_6 = arith.constant 0 : index
    %17 = vector.load %arg7[%c0_5, %c0_6] : memref<256x128xbf16, #tpu.memory_space<vmem>>, vector<256x128xbf16>
    %cst_7 = arith.constant dense<0.000000e+00> : vector<8x256xf32>
    %18 = tpu.matmul %16, %17, %cst_7 {dimension_numbers = #tpu.dot_dimension_numbers<[1], [1], [0], [0], [0, 0, 1, 0], [], []>} : vector<8x128xbf16>, vector<256x128xbf16>, vector<8x256xf32> -> vector<8x256xf32>
    %cst_8 = arith.constant -1.000000e+00 : f32
    %cst_9 = arith.constant 1.000000e+00 : f32
    %19 = vector.broadcast %cst_8 : f32 to vector<8x256xf32>
    %20 = arith.maximumf %19, %18 : vector<8x256xf32>
    %21 = vector.broadcast %cst_9 : f32 to vector<8x256xf32>
    %22 = arith.minimumf %21, %20 : vector<8x256xf32>
    %c0_10 = arith.constant 0 : index
    %c0_11 = arith.constant 0 : index
    %23 = vector.load %arg4[%c0_10, %c0_11] : memref<8x128xf32, #tpu.memory_space<vmem>>, vector<8x128xf32>
    %24 = arith.mulf %23, %23 : vector<8x128xf32>
    %cst_12 = arith.constant dense<0.000000e+00> : vector<8xf32>
    %25 = vector.multi_reduction <add>, %24, %cst_12 [1] : vector<8x128xf32> to vector<8xf32>
    %26 = vector.shape_cast %25 : vector<8xf32> to vector<8x1xf32>
    %cst_13 = arith.constant 1.000000e-10 : f32
    %27 = vector.broadcast %cst_13 : f32 to vector<8x1xf32>
    %28 = arith.cmpf ogt, %26, %27 : vector<8x1xf32>
    %cst_14 = arith.constant 1.000000e-30 : f32
    %29 = vector.broadcast %cst_14 : f32 to vector<8x1xf32>
    %30 = arith.maximumf %26, %29 : vector<8x1xf32>
    %31 = math.rsqrt %30 : vector<8x1xf32>
    %cst_15 = arith.constant 1.000000e+05 : f32
    %32 = vector.broadcast %cst_15 : f32 to vector<8x1xf32>
    %33 = arith.select %28, %31, %32 : vector<8x1xi1>, vector<8x1xf32>
    %34 = vector.broadcast %33 : vector<8x1xf32> to vector<8x128xf32>
    %35 = arith.mulf %23, %34 : vector<8x128xf32>
    %36 = arith.mulf %15, %35 : vector<8x128xf32>
    %cst_16 = arith.constant dense<0.000000e+00> : vector<8xf32>
    %37 = vector.multi_reduction <add>, %36, %cst_16 [1] : vector<8x128xf32> to vector<8xf32>
    %38 = vector.shape_cast %37 : vector<8xf32> to vector<8x1xf32>
    %cst_17 = arith.constant -1.000000e+00 : f32
    %cst_18 = arith.constant 1.000000e+00 : f32
    %39 = vector.broadcast %cst_17 : f32 to vector<8x1xf32>
    %40 = arith.maximumf %39, %38 : vector<8x1xf32>
    %41 = vector.broadcast %cst_18 : f32 to vector<8x1xf32>
    %42 = arith.minimumf %41, %40 : vector<8x1xf32>
    %43 = arith.mulf %42, %42 : vector<8x1xf32>
    %cst_19 = arith.constant 1.000000e+00 : f32
    %44 = vector.broadcast %cst_19 : f32 to vector<8x1xf32>
    %45 = arith.subf %44, %43 : vector<8x1xf32>
    %cst_20 = arith.constant 0.000000e+00 : f32
    %46 = vector.broadcast %cst_20 : f32 to vector<8x1xf32>
    %47 = arith.maximumf %45, %46 : vector<8x1xf32>
    %48 = math.sqrt %47 : vector<8x1xf32>
    %cst_21 = arith.constant 0.955336511 : f32
    %49 = vector.broadcast %cst_21 : f32 to vector<8x1xf32>
    %50 = arith.mulf %42, %49 : vector<8x1xf32>
    %cst_22 = arith.constant 0.295520216 : f32
    %51 = vector.broadcast %cst_22 : f32 to vector<8x1xf32>
    %52 = arith.mulf %48, %51 : vector<8x1xf32>
    %53 = arith.subf %50, %52 : vector<8x1xf32>
    %cst_23 = arith.constant -0.955336511 : f32
    %54 = vector.broadcast %cst_23 : f32 to vector<8x1xf32>
    %55 = arith.cmpf ole, %42, %54 : vector<8x1xf32>
    %cst_24 = arith.constant 1.000000e+00 : f32
    %cst_25 = arith.constant 0.000000e+00 : f32
    %56 = vector.broadcast %cst_24 : f32 to vector<8x1xf32>
    %57 = vector.broadcast %cst_25 : f32 to vector<8x1xf32>
    %58 = arith.select %55, %56, %57 : vector<8x1xi1>, vector<8x1xf32>
    %cst_26 = arith.constant 0.000000e+00 : f32
    %59 = vector.broadcast %cst_26 : f32 to vector<8x1xf32>
    %60 = arith.addf %59, %58 : vector<8x1xf32>
    %cst_27 = arith.constant 5.000000e-01 : f32
    %61 = vector.broadcast %cst_27 : f32 to vector<8x1xf32>
    %62 = arith.mulf %60, %61 : vector<8x1xf32>
    %63 = math.floor %62 : vector<8x1xf32>
    %cst_28 = arith.constant 2.000000e+00 : f32
    %64 = vector.broadcast %cst_28 : f32 to vector<8x1xf32>
    %65 = arith.mulf %64, %63 : vector<8x1xf32>
    %66 = arith.subf %60, %65 : vector<8x1xf32>
    %cst_29 = arith.constant 0.000000e+00 : f32
    %67 = vector.broadcast %cst_29 : f32 to vector<8x1xf32>
    %68 = arith.cmpf oeq, %66, %67 : vector<8x1xf32>
    %cst_30 = arith.constant 1.000000e+00 : f32
    %cst_31 = arith.constant -1.000000e+00 : f32
    %69 = vector.broadcast %cst_30 : f32 to vector<8x1xf32>
    %70 = vector.broadcast %cst_31 : f32 to vector<8x1xf32>
    %71 = arith.select %68, %69, %70 : vector<8x1xi1>, vector<8x1xf32>
    %72 = arith.mulf %71, %53 : vector<8x1xf32>
    %cst_32 = arith.constant 2.000000e+00 : f32
    %73 = vector.broadcast %cst_32 : f32 to vector<8x1xf32>
    %74 = arith.mulf %73, %60 : vector<8x1xf32>
    %75 = arith.subf %72, %74 : vector<8x1xf32>
    %cst_33 = arith.constant 1.000000e-01 : f32
    %76 = vector.broadcast %cst_33 : f32 to vector<8x1xf32>
    %77 = arith.subf %75, %76 : vector<8x1xf32>
    %78 = tpu.iota {dimensions = array<i32: 1>} : vector<8x256xi32>
    %c256_i32 = arith.constant 256 : i32
    %79 = arith.muli %arg0, %c256_i32 : i32
    %80 = vector.broadcast %79 : i32 to vector<8x256xi32>
    %81 = arith.addi %78, %80 : vector<8x256xi32>
    %c0_34 = arith.constant 0 : index
    %c0_35 = arith.constant 0 : index
    %82 = vector.load %arg5[%c0_34, %c0_35] : memref<8x1xi32, #tpu.memory_space<vmem>>, vector<8x1xi32>
    %83 = vector.broadcast %82 : vector<8x1xi32> to vector<8x256xi32>
    %84 = arith.cmpi eq, %81, %83 : vector<8x256xi32>
    %85 = vector.shape_cast %77 : vector<8x1xf32> to vector<8x1xf32>
    %86 = vector.broadcast %85 : vector<8x1xf32> to vector<8x256xf32>
    %87 = arith.select %84, %86, %22 : vector<8x256xi1>, vector<8x256xf32>
    %cst_36 = arith.constant 3.000000e+01 : f32
    %88 = vector.broadcast %cst_36 : f32 to vector<8x256xf32>
    %89 = arith.mulf %87, %88 : vector<8x256xf32>
    %c0_37 = arith.constant 0 : index
    %c0_38 = arith.constant 0 : index
    %90 = vector.load %arg6[%c0_37, %c0_38] : memref<8x256xf32, #tpu.memory_space<vmem>>, vector<8x256xf32>
    tpu.vector_store %arg6[%c0_37, %c0_38], %89 {strides = array<i32>} : memref<8x256xf32, #tpu.memory_space<vmem>>, vector<8x256xf32>,
    return
  }
  func.func @transform_0(%arg0: i32, %arg1: i32) -> (i32, i32) {
    %c0_i32 = arith.constant 0 : i32
    %c0_i32_0 = arith.constant 0 : i32
    return %arg1, %c0_i32 : i32, i32
  }
  func.func @transform_1(%arg0: i32, %arg1: i32) -> (i32, i32) {
    %c0_i32 = arith.constant 0 : i32
    %c0_i32_0 = arith.constant 0 : i32
    return %arg0, %c0_i32 : i32, i32
  }
  func.func @transform_2(%arg0: i32, %arg1: i32) -> (i32, i32) {
    %c0_i32 = arith.constant 0 : i32
    %c0_i32_0 = arith.constant 0 : i32
    return %arg1, %c0_i32 : i32, i32
  }
  func.func @transform_3(%arg0: i32, %arg1: i32) -> (i32, i32) {
    %c0_i32 = arith.constant 0 : i32
    %c0_i32_0 = arith.constant 0 : i32
    return %arg1, %c0_i32 : i32, i32
  }
  func.func @transform_4(%arg0: i32, %arg1: i32) -> (i32, i32) {
    %c0_i32 = arith.constant 0 : i32
    return %arg1, %arg0 : i32, i32
  }
}

</mosaic_0001>

<bundles_post_ra>
// kernel: tpu_custom_call.1
= control target key start
LH: loop header
LB: loop body
LE: loop exit
PB: predicated region body
PF: predicated region fallthrough
CT: control target
= control target key end

     0   :  { %s3055_s0 = inlined_call_operand.vmem [shape: f32[16,128], index: 0, kind: input, shape index: {}]   ;;  %s3056_s1 = inlined_call_operand.hbm [shape: f32[512,128], index: 1, kind: input, shape index: {}]   ;;  %s3057_s2 = inlined_call_operand.hbm [shape: f32[16,128], index: 2, kind: input, shape index: {}]   ;;  %s3058_s3 = inlined_call_operand.vmem [shape: s32[16,1], index: 3, kind: input, shape index: {}]   ;;  %s3059_s4 = inlined_call_operand.hbm [shape: f32[16,512], index: 4, kind: output, shape index: {}]  }
   0x1   :  { %3068 = sst [smem:[#allocation20_spill]] %s3056_s1 }
   0x2   :  { %3069 = sst [smem:[#allocation21_spill]] %s3059_s4 }
   0x3   :  { %9 = vsyncpa [#allocation4], 0 }
   0x4   :  { %11 = vsyncpa [#allocation4 + $0x1], 0 }
   0x5   :  { %12 = vsyncpa [#allocation7], 0 }
   0x6   :  { %14 = vsyncpa [#allocation7 + $0x1], 0 }
   0x7   :  { %15 = vsyncpa [#allocation5], 0 }
   0x8   :  { %17 = vsyncpa [#allocation5 + $0x1], 0  ;;  %s2011_s15 = smov 0   ;;  %s2013_s16 = smov 0  }
   0x9   :  { %s2015_s17 = smov 0   ;;  %s2017_s18 = smov 0  }
   0xa   :  { %s2019_s19 = smov 0   ;;  %s2021_s20 = smov 0  }
   0xb   :  { %s2023_s21 = smov 0   ;;  %s2025_s22 = smov 0  }
   0xc   :  { %s2027_s23 = smov 0   ;;  %s2029_s24 = smov 0  }
   0xd   :  { %s2031_s25 = smov 0   ;;  %s2033_s26 = smov 0  }
   0xe   :  { %s2035_s27 = smov 0   ;;  %s2037_s28 = smov 0  }
   0xf LB: > { %3070 = sst [smem:[#allocation12_spill]] %s1947_s20  ;;  %p75_p0 = scmp.ne.s32.totalorder %s1959_s23, %s1955_s22  ;;  %s1979_s28 = sphi %s2037_s28, %s23_s28   ;;  %s1975_s27 = sphi %s2035_s27, %s3110_s27   ;;  %s1971_s26 = sphi %s2033_s26, %s3109_s26   ;;  %s1967_s25 = sphi %s2031_s25, %s3108_s25   ;;  %s1963_s24 = sphi %s2029_s24, %s3107_s24   ;;  %s1959_s23 = sphi %s2027_s23, %s3106_s23   ;;  %s1955_s22 = sphi %s2025_s22, %s3117_s22   ;;  %s1951_s21 = sphi %s2023_s21, %s3116_s21   ;;  %s1947_s20 = sphi %s2021_s20, %s3104_s20   ;;  %s1943_s19 = sphi %s2019_s19, %s3115_s19   ;;  %s1939_s18 = sphi %s2017_s18, %s3114_s18   ;;  %s1935_s17 = sphi %s2015_s17, %s3113_s17   ;;  %s1931_s16 = sphi %s2013_s16, %s3112_s16   ;;  %s1927_s15 = sphi %s2011_s15, %s3111_s15  }
  0x10   : > { %3071 = sst [smem:[#allocation13_spill]] %s1959_s23  ;;  %p76_p1 = scmp.eq.s32.totalorder %s1979_s28, 0 }
  0x11   : > { %3072 = sst [smem:[#allocation14_spill]] %s1971_s26  ;;  %p3062_p2 = scmp.lt.s32.totalorder %s1979_s28, 4 }
  0x12   : > { %3073 = sst [smem:[#allocation15_spill]] %s1975_s27  ;;  %p77_p3 = por %p76_p1, %p75_p0 }
  0x13   : > { %s192_s30 = sand.u32 1, %s1959_s23   ;;  %s1442_s6 = sshll.u32 %s1975_s27, 8 }
  0x14   : > { %s1355_s5 = sshll.u32 %s192_s30, 8  ;;  %s3074_s1 = sld [smem:[#allocation20_spill]] }
  0x15   : > { %s196_s10 = scalar_lea.vmem [#allocation3], %s1355_s5  ;;  %p1561_p4 = pnand %p3062_p2, %p77_p3 }
  0x16   : > { %s204_s11 = sshll.u32 %s196_s10, 4  ;;  %p1360_p5 = scmp.ge.s32.totalorder %s1979_s28, 1  ;;  %s205_s11 = int_to_ptr.vmem [resolvable:$true] %s204_s11 }
  0x17   : > { %s193_s13 = scalar_lea.sflag [#allocation4], %s192_s30  ;;  %s1981_s14 = smov 128  }
  0x18   : > { %s1982_s29 = smov 8   ;;  %p81_p6 = scmp.ne.s32.totalorder %s1955_s22, %s1951_s21 }
  0x19   : > { %p238_p7 = scmp.lt.s32.totalorder %s1979_s28, 5  ;;  %s32_s7 = sadd.s32 1, %s1971_s26 }
  0x1a   : > { %s201_s9 = scalar_lea.hbm %s3074_s1, %s1442_s6  ;;  %s1351_s6 = sadd.s32 4294967295, %s1979_s28  }
  0x1b   : > { %s202_s12 = sshll.u32 %s201_s9, 4  ;;  %p2099_p8 = pnand %p1360_p5, %p238_p7  ;;  %s203_s12 = int_to_ptr.hbm [resolvable:$true] %s202_s12 }
  0x1c   : > { %1563 = dma.hbm_to_vmem [thread:$0]  (!%p1561_p4), %s203_s12, 4096, %s205_s11, %s193_s13, %s1981_s14, %s1981_s14, %s1982_s29  }
  0x1d   : > { %s35_s8 = sadd.s32 1, %s1975_s27  ;;  %p33_p9 = scmp.ge.s32.totalorder %s32_s7, 2 }
  0x1e   : > { %p2106_p10 = scmp.eq.s32.totalorder %s1351_s6, 0  ;;  %s1352_s21 = sadd.s32 4294967294, %s1979_s28  }
  0x1f   : > { %s94_s29 = sadd.s32 1, %s1947_s20  ;;  %s3119_s7 = smov (%p33_p9, %s32_s7), 0 }
  0x20   : > { %3077 = sst [smem:[#allocation16_spill]] %s3119_s7  ;;  %s3121_s8 = smov (!%p33_p9, %s35_s8), %s1975_s27 }
  0x21   : > { %p2117_p11 = por %p2106_p10, %p81_p6  ;;  %s91_s10 = ssub.s32 %s1971_s26, %s3119_s7 }
  0x22   : > { %p37_p12 = scmp.ge.s32.totalorder %s3121_s8, 2  ;;  %p92_p13 = scmp.eq.s32.totalorder %s91_s10, 0 }
  0x23   : > { %p101_p0 = scmp.ne.s32.totalorder %s1947_s20, %s1943_s19  ;;  %p107_p3 = scmp.ne.s32.totalorder %s1943_s19, %s1939_s18 }
  0x24   : > { %s3123_s8 = smov (%p37_p12, %s3121_s8), 0  ;;  %s148_s18 = sadd.s32 1, %s1935_s17 }
  0x25   : > { %3079 = sst [smem:[#allocation17_spill]] %s3123_s8  ;;  %s65_s12 = ssub.s32 %s1975_s27, %s3123_s8 }
  0x26   : > { %s2130_s11 = scalar_select %p92_p13, %s1947_s20, %s94_s29  }
  0x27   : > { %p2136_p4 = por %p107_p3, %p2106_p10  ;;  %p66_p5 = scmp.eq.s32.totalorder %s65_s12, 0 }
  0x28   : > { %3080 = sst [smem:[#allocation18_spill]] %s2130_s11  ;;  %s145_s14 = sor.u32 %s91_s10, %s65_s12 }
  0x29   : > { %p146_p6 = scmp.eq.s32.totalorder %s145_s14, 0  ;;  %s3082_s1 = sadd.s32 1, %s1959_s23 }
  0x2a   : > { %s2144_s7 = scalar_select %p66_p5, %s1959_s23, %s3082_s1  }
  0x2b   : > { %s2147_s4 = scalar_select %p146_p6, %s1935_s17, %s148_s18  }
  0x2c   : > { %3083 = sst [smem:[#allocation19_spill]] %s2144_s7  ;;  %p158_p7 = scmp.ne.s32.totalorder %s1935_s17, %s1931_s16 }
  0x2d   : > { %p159_p9 = scmp.eq.s32.totalorder %s1351_s6, 3  ;;  %p164_p12 = scmp.ne.s32.totalorder %s1931_s16, %s1927_s15 }
  0x2e   : > { %p165_p13 = scmp.eq.s32.totalorder %s1352_s21, 3  ;;  %s214_s29 = sand.u32 1, %s1947_s20  }
  0x2f   : > { %p2153_p2 = por %p159_p9, %p158_p7  ;;  %p103_p10 = por %p101_p0, %p76_p1 }
  0x30   : > { %p2163_p3 = por %p165_p13, %p164_p12  ;;  %s1358_s1 = sshll.u32 %s214_s29, 3 }
  0x31   : > { %s1359_s12 = sshll.u32 %s1971_s26, 3  ;;  %s218_s21 = scalar_lea.vmem [#allocation6], %s1358_s1 }
  0x32   : > { %s222_s6 = scalar_lea.hbm %s3057_s2, %s1359_s12  ;;  %s226_s27 = sshll.u32 %s218_s21, 4  ;;  %s227_s27 = int_to_ptr.vmem [resolvable:$true] %s226_s27 }
  0x33   : > { %s224_s8 = sshll.u32 %s222_s6, 4  ;;  %p3086_p5 = scmp.lt.s32.totalorder %s1979_s28, 4  ;;  %s225_s8 = int_to_ptr.hbm [resolvable:$true] %s224_s8 }
  0x34   : > { %s215_s7 = scalar_lea.sflag [#allocation7], %s214_s29  ;;  %242 = sbr.rel (%p2099_p8) target bundleno = 625 (0x271), region = 36 }
  0x35   : > { %p1564_p6 = pnand %p3086_p5, %p103_p10  ;;  %s244_s23 = sand.u32 (!%p2099_p8), 1, %s1955_s22  }
  0x36   : > { %s1361_s26 = sshll.u32 (!%p2099_p8), %s244_s23, 8  ;;  %s245_s11 = scalar_lea.sflag (!%p2099_p8), [#allocation4], %s244_s23 }
  0x37   : > { %1566 = dma.hbm_to_vmem [thread:$0]  (!%p1564_p6), %s225_s8, 128, %s227_s27, %s215_s7  }
  0x38   : > { %s2176_s20 = scalar_lea.vmem (!%p2099_p8), [#allocation3], %s1361_s26 }
  0x39   : > { %1914 = dma.done.wait (%p2117_p11), %s245_s11, 4096  }
  0x3a   : > { %1916 = vsyncadd (%p2117_p11), %s245_s11, 4294963200  ;;  %s254_s1 = sand.u32 1, %s1943_s19  }
  0x3b   : > { %s2183_s29 = sshll.u32 %s254_s1, 3  ;;  %s255_s27 = scalar_lea.sflag [#allocation7], %s254_s1 }
  0x3c   : > { %s258_s5 = scalar_lea.vmem [#allocation6], %s2183_s29 }
  0x3d   : > { %1918 = dma.done.wait (%p2136_p4), %s255_s27, 128  }
  0x3e   : > { %1920 = vsyncadd (%p2136_p4), %s255_s27, 4294967168  ;;  %s294_s23 = sand.u32 1, %s1931_s16   ;;  %p297_p1 = scmp.lt.s32.totalorder %s1963_s24, 1 }
  0x3f   : > { %s1363_s26 = sshll.u32 %s294_s23, 4  ;;  %p1366_p8 = scmp.ne.s32.totalorder %s1963_s24, 0 }
  0x40   : > { %s298_s7 = scalar_select %p297_p1, %s1963_s24, 1 }
  0x41   : > { %s2205_s6 = scalar_lea.vmem [#allocation8], %s1363_s26  ;;  %310 = sbr.rel (%p1366_p8) target bundleno = 311 (0x137), region = 48 }
  0x42   : > { %s1364_s8 = sshll.u32 %s298_s7, 3 }
  0x43   : > { %s2198_s12 = scalar_lea.vmem %s3055_s0, %s1364_s8  ;;  %s2203_s13 = scalar_lea.vmem %s3058_s3, %s1364_s8 }
  0x46   : > { %v2209_v0 = vld [vmem:[%s2176_s20 + $0x20] sm:$0xff]  ;;  %v2212_v1 = vld [vmem:[%s2176_s20 + $0x10] sm:$0xff]  ;;  %v2224_v6 = vld [vmem:[%s2176_s20 + $0x28] sm:$0xff] }
  0x47   : > { %v2215_v2 = vld [vmem:[%s2176_s20] sm:$0xff]  ;;  %v347_v3 = vmul.f32 %v2209_v0, %v2209_v0  ;;  %v345_v4 = vmul.f32 %v2212_v1, %v2212_v1  ;;  %v2227_v7 = vld [vmem:[%s2176_s20 + $0x18] sm:$0xff]  ;;  %v2230_v8 = vld [vmem:[%s2176_s20 + $0x8] sm:$0xff]  ;;  %v348_v9 = vmul.f32 %v2224_v6, %v2224_v6 }
  0x48   : > { %v343_v5 = vmul.f32 %v2215_v2, %v2215_v2  ;;  %v346_v10 = vmul.f32 %v2227_v7, %v2227_v7  ;;  %v344_v11 = vmul.f32 %v2230_v8, %v2230_v8  ;;  %v2239_v12 = vld [vmem:[%s2176_s20 + $0x40] sm:$0xff]  ;;  %v2242_v13 = vld [vmem:[%s2176_s20 + $0x38] sm:$0xff]  ;;  %v2245_v14 = vld [vmem:[%s2176_s20 + $0x30] sm:$0xff] }
  0x49   : > { %383 = vadd.xlane.f32.xlu2 %v347_v3  ;;  %379 = vadd.xlane.f32.xlu1 %v345_v4  ;;  %v351_v15 = vmul.f32 %v2239_v12, %v2239_v12  ;;  %v350_v16 = vmul.f32 %v2242_v13, %v2242_v13  ;;  %v349_v17 = vmul.f32 %v2245_v14, %v2245_v14  ;;  %v2254_v18 = vld [vmem:[%s2176_s20 + $0x58] sm:$0xff]  ;;  %v2257_v19 = vld [vmem:[%s2176_s20 + $0x50] sm:$0xff]  ;;  %v2260_v20 = vld [vmem:[%s2176_s20 + $0x48] sm:$0xff] }
  0x4a   : > { %375 = vadd.xlane.f32.xlu0 %v343_v5  ;;  %v354_v21 = vmul.f32 %v2254_v18, %v2254_v18  ;;  %v353_v22 = vmul.f32 %v2257_v19, %v2257_v19  ;;  %v352_v23 = vmul.f32 %v2260_v20, %v2260_v20  ;;  %v2269_v24 = vld [vmem:[%s2176_s20 + $0x70] sm:$0xff]  ;;  %v2272_v25 = vld [vmem:[%s2176_s20 + $0x68] sm:$0xff]  ;;  %v2275_v26 = vld [vmem:[%s2176_s20 + $0x60] sm:$0xff] }
  0x4b   : > { %v357_v27 = vmul.f32 %v2269_v24, %v2269_v24  ;;  %v356_v28 = vmul.f32 %v2272_v25, %v2272_v25  ;;  %v355_v29 = vmul.f32 %v2275_v26, %v2275_v26  ;;  %v2284_v30 = vld [vmem:[%s2176_s20 + $0x88] sm:$0xff]  ;;  %v2287_v31 = vld [vmem:[%s2176_s20 + $0x80] sm:$0xff]  ;;  %v2290_v32 = vld [vmem:[%s2176_s20 + $0x78] sm:$0xff] }
  0x4c   : > { %v360_v33 = vmul.f32 %v2284_v30, %v2284_v30  ;;  %v359_v34 = vmul.f32 %v2287_v31, %v2287_v31  ;;  %v358_v35 = vmul.f32 %v2290_v32, %v2290_v32  ;;  %v2299_v36 = vld [vmem:[%s2176_s20 + $0xa0] sm:$0xff]  ;;  %v2302_v37 = vld [vmem:[%s2176_s20 + $0x98] sm:$0xff]  ;;  %v2305_v38 = vld [vmem:[%s2176_s20 + $0x90] sm:$0xff] }
  0x4d   : > { %v363_v39 = vmul.f32 %v2299_v36, %v2299_v36  ;;  %v362_v40 = vmul.f32 %v2302_v37, %v2302_v37  ;;  %v361_v41 = vmul.f32 %v2305_v38, %v2305_v38  ;;  %v2314_v42 = vld [vmem:[%s2176_s20 + $0xb8] sm:$0xff]  ;;  %v2317_v43 = vld [vmem:[%s2176_s20 + $0xb0] sm:$0xff]  ;;  %v2320_v44 = vld [vmem:[%s2176_s20 + $0xa8] sm:$0xff] }
  0x4e   : > { %v366_v45 = vmul.f32 %v2314_v42, %v2314_v42  ;;  %v365_v46 = vmul.f32 %v2317_v43, %v2317_v43  ;;  %v364_v47 = vmul.f32 %v2320_v44, %v2320_v44  ;;  %v337_v48 = vld [vmem:[%s2176_s20 + $0xd0] sm:$0xff]  ;;  %v2330_v49 = vld [vmem:[%s2176_s20 + $0xc8] sm:$0xff]  ;;  %v335_v50 = vld [vmem:[%s2176_s20 + $0xc0] sm:$0xff] }
  0x4f   : > { %v369_v51 = vmul.f32 %v337_v48, %v337_v48  ;;  %v368_v52 = vmul.f32 %v2330_v49, %v2330_v49  ;;  %v367_v53 = vmul.f32 %v335_v50, %v335_v50  ;;  %v340_v54 = vld [vmem:[%s2176_s20 + $0xe8] sm:$0xff]  ;;  %v339_v55 = vld [vmem:[%s2176_s20 + $0xe0] sm:$0xff]  ;;  %v338_v56 = vld [vmem:[%s2176_s20 + $0xd8] sm:$0xff] }
  0x50   : > { %v372_v57 = vmul.f32 %v340_v54, %v340_v54  ;;  %v371_v58 = vmul.f32 %v339_v55, %v339_v55  ;;  %v370_v59 = vmul.f32 %v338_v56, %v338_v56  ;;  %v342_v60 = vld [vmem:[%s2176_s20 + $0xf8] sm:$0xff]  ;;  %v341_v61 = vld [vmem:[%s2176_s20 + $0xf0] sm:$0xff] }
  0x51   : > { %385 = vadd.xlane.f32.xlu2 %v348_v9  ;;  %381 = vadd.xlane.f32.xlu1 %v346_v10  ;;  %v374_v62 = vmul.f32 %v342_v60, %v342_v60  ;;  %v373_v63 = vmul.f32 %v341_v61, %v341_v61 }
  0x52   : > { %377 = vadd.xlane.f32.xlu0 %v344_v11 }
  0x59   : > { %391 = vadd.xlane.f32.xlu2 %v351_v15  ;;  %389 = vadd.xlane.f32.xlu1 %v350_v16 }
  0x5a   : > { %387 = vadd.xlane.f32.xlu0 %v349_v17 }
  0x61   : > { %397 = vadd.xlane.f32.xlu2 %v354_v21  ;;  %395 = vadd.xlane.f32.xlu1 %v353_v22 }
  0x62   : > { %393 = vadd.xlane.f32.xlu0 %v352_v23 }
  0x69   : > { %403 = vadd.xlane.f32.xlu2 %v357_v27  ;;  %401 = vadd.xlane.f32.xlu1 %v356_v28 }
  0x6a   : > { %399 = vadd.xlane.f32.xlu0 %v355_v29 }
  0x71   : > { %409 = vadd.xlane.f32.xlu2 %v360_v33  ;;  %407 = vadd.xlane.f32.xlu1 %v359_v34 }
  0x72   : > { %405 = vadd.xlane.f32.xlu0 %v358_v35 }
  0x79   : > { %415 = vadd.xlane.f32.xlu2 %v363_v39  ;;  %413 = vadd.xlane.f32.xlu1 %v362_v40 }
  0x7a   : > { %411 = vadd.xlane.f32.xlu0 %v361_v41 }
  0x81   : > { %421 = vadd.xlane.f32.xlu2 %v366_v45  ;;  %419 = vadd.xlane.f32.xlu1 %v365_v46 }
  0x82   : > { %417 = vadd.xlane.f32.xlu0 %v364_v47 }
  0x89   : > { %427 = vadd.xlane.f32.xlu2 %v369_v51  ;;  %425 = vadd.xlane.f32.xlu1 %v368_v52 }
  0x8a   : > { %423 = vadd.xlane.f32.xlu0 %v367_v53 }
  0x91   : > { %433 = vadd.xlane.f32.xlu2 %v372_v57  ;;  %431 = vadd.xlane.f32.xlu1 %v371_v58 }
  0x92   : > { %429 = vadd.xlane.f32.xlu0 %v370_v59 }
  0x99   : > { %437 = vadd.xlane.f32.xlu1 %v374_v62 }
  0x9a   : > { %435 = vadd.xlane.f32.xlu0 %v373_v63 }
  0xbc   : > { %v2340_v3 = vpop.xlane.xlu2 %383  ;;  %v2342_v4 = vpop.xlane.xlu1 %379 }
  0xbd   : > { %v475_v5 = vmax.f32 %v2340_v3, 1e-30  ;;  %v2345_v9 = vpop.xlane.xlu0 %375  ;;  %v473_v10 = vmax.f32 %v2342_v4, 1e-30  ;;  %vm443_vm0 = vcmp.gt.f32.partialorder %v2340_v3, 1e-10 }
  0xbe   : > { %v2349_v11 = vmax.f32 %v2345_v9, 1e-30  ;;  %vm441_vm4 = vcmp.gt.f32.partialorder %v2342_v4, 1e-10  ;;  %vm439_vm8 = vcmp.gt.f32.partialorder %v2345_v9, 1e-10 }
  0xbf   : > { %1690 = vrsqrt.f32 %v475_v5  ;;  %vm549_vm1 = vweird.f32 %v475_v5  ;;  %vm529_vm5 = vweird.f32 %v473_v10 }
  0xc0   : > { %1692 = vrsqrt.f32 %v473_v10  ;;  %vm509_vm6 = vweird.f32 %v2349_v11 }
  0xc1   : > { %1694 = vrsqrt.f32 %v2349_v11 }
  0xc4   : > { %v2352_v15 = vpop.xlane.xlu2 %385  ;;  %v2354_v16 = vpop.xlane.xlu1 %381 }
  0xc5   : > { %v2356_v17 = vpop.eup %1690  ;;  %v2359_v21 = vmax.f32 %v2352_v15, 1e-30  ;;  %v2361_v22 = vpop.xlane.xlu0 %377  ;;  %v2367_v28 = vmax.f32 %v2354_v16, 1e-30  ;;  %vm444_vm9 = vcmp.gt.f32.partialorder %v2352_v15, 1e-10 }
  0xc6   : > { %v2363_v23 = vpop.eup %1692  ;;  %v544_v27 = vmul.f32 %v2356_v17, %v475_v5  ;;  %v2379_v40 = vmax.f32 %v2361_v22, 1e-30  ;;  %vm550_vm2 = vweird.f32 %v2356_v17  ;;  %vm442_vm11 = vcmp.gt.f32.partialorder %v2354_v16, 1e-10 }
  0xc7   : > { %v2369_v29 = vpop.eup %1694  ;;  %v524_v33 = vmul.f32 %v2363_v23, %v473_v10  ;;  %1696 = vrsqrt.f32 %v2359_v21  ;;  %vm530_vm3 = vweird.f32 %v2363_v23  ;;  %vm2412_vm7 = vmor %vm549_vm1, %vm550_vm2  ;;  %vm559_vm10 = vweird.f32 %v2359_v21 }
  0xc8   : > { %v545_v34 = vmul.f32 %v2356_v17, %v544_v27  ;;  %v504_v35 = vmul.f32 %v2369_v29, %v2349_v11  ;;  %1698 = vrsqrt.f32 %v2367_v28  ;;  %vm2426_vm12 = vmor %vm529_vm5, %vm530_vm3  ;;  %vm510_vm13 = vweird.f32 %v2369_v29 }
  0xc9   : > { %v525_v39 = vmul.f32 %v2363_v23, %v524_v33  ;;  %1700 = vrsqrt.f32 %v2379_v40  ;;  %vm539_vm14 = vweird.f32 %v2367_v28  ;;  %vm519_vm15 = vweird.f32 %v2379_v40  ;;  %vm2460_vm3 = vmor %vm509_vm6, %vm510_vm13 }
  0xca   : > { %v546_v41 = vmul.f32 0.5, %v545_v34  ;;  %v505_v45 = vmul.f32 %v2369_v29, %v504_v35 }
  0xcb   : > { %v526_v46 = vmul.f32 0.5, %v525_v39 }
  0xcc   : > { %v547_v47 = vsub.f32 1.5, %v546_v41  ;;  %v506_v48 = vmul.f32 0.5, %v505_v45  ;;  %v2383_v50 = vpop.xlane.xlu2 %391  ;;  %v2385_v51 = vpop.xlane.xlu1 %389 }
  0xcd   : > { %v2387_v52 = vpop.eup %1696  ;;  %v527_v53 = vsub.f32 1.5, %v526_v46  ;;  %v2391_v54 = vmax.f32 %v2383_v50, 1e-30  ;;  %v2393_v55 = vpop.xlane.xlu0 %387  ;;  %v2442_v46 = vmax.f32 %v2385_v51, 1e-30 }
  0xce   : > { %v2395_v56 = vpop.eup %1698  ;;  %v548_v57 = vmul.f32 %v2356_v17, %v547_v47  ;;  %v554_v58 = vmul.f32 %v2387_v52, %v2359_v21  ;;  %v507_v60 = vsub.f32 1.5, %v506_v48  ;;  %vm560_vm1 = vweird.f32 %v2387_v52 }
  0xcf   : > { %v528_v59 = vmul.f32 %v2363_v23, %v527_v53  ;;  %v534_v61 = vmul.f32 %v2395_v56, %v2367_v28  ;;  %1702 = vrsqrt.f32 %v2391_v54  ;;  %v2409_v63 = vpop.eup %1700  ;;  %vm540_vm2 = vweird.f32 %v2395_v56 }
  0xd0   : > { %v555_v62 = vmul.f32 %v2387_v52, %v554_v58  ;;  %v552_v33 = vsel %vm2412_vm7, %v2356_v17, %v548_v57  ;;  %v508_v39 = vmul.f32 %v2369_v29, %v507_v60  ;;  %v514_v17 = vmul.f32 %v2409_v63, %v2379_v40 }
  0xd1   : > { %v535_v10 = vmul.f32 %v2395_v56, %v534_v61  ;;  %v532_v35 = vsel %vm2426_vm12, %v2363_v23, %v528_v59  ;;  %v827_v23 = vsel %vm443_vm0, %v552_v33, 100000.0  ;;  %v2452_v58 = vmax.f32 %v2393_v55, 1e-30  ;;  %vm561_vm0 = vmor %vm559_vm10, %vm560_vm1 }
  0xd2   : > { %v556_v34 = vmul.f32 0.5, %v555_v62  ;;  %v515_v57 = vmul.f32 %v2409_v63, %v514_v17  ;;  %v825_v59 = vsel %vm441_vm4, %v532_v35, 100000.0  ;;  %1704 = vrsqrt.f32 %v2442_v46  ;;  %vm541_vm4 = vmor %vm539_vm14, %vm540_vm2 }
  0xd3   : > { %v536_v41 = vmul.f32 0.5, %v535_v10  ;;  %v512_v4 = vsel %vm2460_vm3, %v2369_v29, %v508_v39  ;;  %1706 = vrsqrt.f32 %v2452_v58  ;;  %v859_v33 = vmul.f32 %v827_v23, %v2209_v0 }
  0xd4   : > { %v557_v45 = vsub.f32 1.5, %v556_v34  ;;  %v2444_v47 = vpop.xlane.xlu2 %397  ;;  %v2468_v62 = vpop.xlane.xlu1 %395  ;;  %v516_v27 = vmul.f32 0.5, %v515_v57  ;;  %vm520_vm5 = vweird.f32 %v2409_v63  ;;  %v857_v0 = vmul.f32 %v825_v59, %v2212_v1 }
  0xd5   : > { %v2446_v48 = vpop.eup %1702  ;;  %v537_v53 = vsub.f32 1.5, %v536_v41  ;;  %v2479_v10 = vpop.xlane.xlu0 %393  ;;  %v2493_v39 = vmax.f32 %v2444_v47, 1e-30  ;;  %vm521_vm6 = vmor %vm519_vm15, %vm520_vm5  ;;  %v2511_v1 = vmax.f32 %v2468_v62, 1e-30  ;;  %vm579_vm13 = vweird.f32 %v2442_v46 }
  0xd6   : > { %v558_v3 = vmul.f32 %v2387_v52, %v557_v45  ;;  %v584_v61 = vmul.f32 %v2446_v48, %v2391_v54  ;;  %v517_v35 = vsub.f32 1.5, %v516_v27  ;;  %vm440_vm7 = vcmp.gt.f32.partialorder %v2361_v22, 1e-10 }
  0xd7   : > { %v538_v11 = vmul.f32 %v2395_v56, %v537_v53  ;;  %1708 = vrsqrt.f32 %v2493_v39  ;;  %vm445_vm10 = vcmp.gt.f32.partialorder %v2393_v55, 1e-10  ;;  %vm447_vm12 = vcmp.gt.f32.partialorder %v2383_v50, 1e-10 }
  0xd8   : > { %v562_v5 = vsel %vm561_vm0, %v2387_v52, %v558_v3  ;;  %v585_v21 = vmul.f32 %v2446_v48, %v584_v61  ;;  %v823_v52 = vsel %vm439_vm8, %v512_v4, 100000.0  ;;  %v518_v15 = vmul.f32 %v2409_v63, %v517_v35 }
  0xd9   : > { %v828_v29 = vsel %vm444_vm9, %v562_v5, 100000.0  ;;  %v542_v34 = vsel %vm541_vm4, %v2395_v56, %v538_v11  ;;  %v2504_v56 = vpop.eup %1704  ;;  %v855_v57 = vmul.f32 %v823_v52, %v2215_v2  ;;  %vm589_vm8 = vweird.f32 %v2391_v54 }
  0xda   : > { %v860_v28 = vmul.f32 %v828_v29, %v2224_v6  ;;  %v826_v41 = vsel %vm442_vm11, %v542_v34, 100000.0  ;;  %v586_v45 = vmul.f32 0.5, %v585_v21  ;;  %v2515_v9 = vpop.eup %1706  ;;  %v522_v16 = vsel %vm521_vm6, %v2409_v63, %v518_v15 }
  0xdb   : > { %v858_v17 = vmul.f32 %v826_v41, %v2227_v7  ;;  %v574_v53 = vmul.f32 %v2504_v56, %v2442_v46  ;;  %v824_v40 = vsel %vm440_vm7, %v522_v16, 100000.0  ;;  %v564_v59 = vmul.f32 %v2515_v9, %v2452_v58 }
  0xdc   : > { %v1472_v23 = vpack.c.bf16 %v860_v28, %v859_v33  ;;  %v2513_v6 = vpop.xlane.xlu2 %403  ;;  %v856_v60 = vmul.f32 %v824_v40, %v2230_v8  ;;  %v587_v3 = vsub.f32 1.5, %v586_v45  ;;  %1710 = vrsqrt.f32 %v2511_v1  ;;  %v2534_v61 = vpop.xlane.xlu1 %401 }
  0xdd   : > { %v1467_v7 = vpack.c.bf16 %v858_v17, %v857_v0  ;;  %v575_v22 = vmul.f32 %v2504_v56, %v574_v53  ;;  %vm446_vm9 = vcmp.gt.f32.partialorder %v2385_v51, 1e-10  ;;  %v565_v2 = vmul.f32 %v2515_v9, %v564_v59  ;;  %v2536_v4 = vpop.eup %1708  ;;  %v2542_v33 = vpop.xlane.xlu0 %399 }
  0xde   : > { %1540 = vst [vmem:[#allocation2 + $0x58] sm:$0xff] %v1472_v23   ;;  %v2532_v63 = vmax.f32 %v2479_v10, 1e-30  ;;  %v1462_v11 = vpack.c.bf16 %v856_v60, %v855_v57  ;;  %vm590_vm11 = vweird.f32 %v2446_v48  ;;  %v2540_v27 = vmax.f32 %v2513_v6, 1e-30 }
  0xdf   : > { %1539 = vst [vmem:[#allocation2] sm:$0xff] %v1467_v7   ;;  %v576_v8 = vmul.f32 0.5, %v575_v22  ;;  %v566_v5 = vmul.f32 0.5, %v565_v2  ;;  %vm569_vm14 = vweird.f32 %v2452_v58  ;;  %v614_v21 = vmul.f32 %v2536_v4, %v2493_v39  ;;  %vm2561_vm2 = vmor %vm589_vm8, %vm590_vm11 }
  0xe0   : > { %1463 = vst [vmem:[#allocation2 + $0x30] sm:$0xff] %v1462_v11   ;;  %v588_v29 = vmul.f32 %v2446_v48, %v587_v3  ;;  %vm580_vm15 = vweird.f32 %v2504_v56  ;;  %1712 = vrsqrt.f32 %v2532_v63  ;;  %vm570_vm1 = vweird.f32 %v2515_v9 }
  0xe1   : > { %v577_v34 = vsub.f32 1.5, %v576_v8  ;;  %v567_v35 = vsub.f32 1.5, %v566_v5  ;;  %v615_v0 = vmul.f32 %v2536_v4, %v614_v21  ;;  %1714 = vrsqrt.f32 %v2540_v27  ;;  %vm581_vm0 = vmor %vm579_vm13, %vm580_vm15 }
  0xe2   : > { %v2555_v52 = vpop.eup %1710  ;;  %vm450_vm3 = vcmp.gt.f32.partialorder %v2444_v47, 1e-10  ;;  %v2568_v17 = vmax.f32 %v2534_v61, 1e-30  ;;  %v2571_v15 = vmax.f32 %v2542_v33, 1e-30  ;;  %vm619_vm4 = vweird.f32 %v2493_v39  ;;  %vm571_vm5 = vmor %vm569_vm14, %vm570_vm1 }
  0xe3   : > { %v578_v41 = vmul.f32 %v2504_v56, %v577_v34  ;;  %v568_v45 = vmul.f32 %v2515_v9, %v567_v35  ;;  %v616_v54 = vmul.f32 0.5, %v615_v0  ;;  %v604_v23 = vmul.f32 %v2555_v52, %v2511_v1 }
  0xe4   : > { %v2579_v7 = vpop.xlane.xlu2 %409  ;;  %v592_v16 = vsel %vm2561_vm2, %v2446_v48, %v588_v29  ;;  %vm620_vm6 = vweird.f32 %v2536_v4  ;;  %1716 = vrsqrt.f32 %v2568_v17  ;;  %vm449_vm7 = vcmp.gt.f32.partialorder %v2468_v62, 1e-10  ;;  %v2608_v2 = vpop.xlane.xlu1 %407 }
  0xe5   : > { %v582_v53 = vsel %vm581_vm0, %v2504_v56, %v578_v41  ;;  %v572_v57 = vsel %vm571_vm5, %v2515_v9, %v568_v45  ;;  %v617_v40 = vsub.f32 1.5, %v616_v54  ;;  %v605_v59 = vmul.f32 %v2555_v52, %v604_v23  ;;  %vm621_vm8 = vmor %vm619_vm4, %vm620_vm6  ;;  %v2622_v11 = vpop.xlane.xlu0 %405 }
  0xe6   : > { %v830_v46 = vsel %vm446_vm9, %v582_v53, 100000.0  ;;  %v2595_v48 = vpop.eup %1712  ;;  %v829_v58 = vsel %vm445_vm10, %v572_v57, 100000.0  ;;  %1718 = vrsqrt.f32 %v2571_v15  ;;  %vm610_vm9 = vweird.f32 %v2555_v52 }
  0xe7   : > { %v862_v56 = vmul.f32 %v830_v46, %v2242_v13  ;;  %v2602_v60 = vpop.eup %1714  ;;  %v861_v51 = vmul.f32 %v829_v58, %v2245_v14  ;;  %v618_v9 = vmul.f32 %v2536_v4, %v617_v40  ;;  %v606_v3 = vmul.f32 0.5, %v605_v59 }
  0xe8   : > { %v594_v22 = vmul.f32 %v2595_v48, %v2532_v63  ;;  %v831_v13 = vsel %vm447_vm12, %v592_v16, 100000.0  ;;  %v644_v14 = vmul.f32 %v2602_v60, %v2540_v27  ;;  %v2620_v55 = vmax.f32 %v2579_v7, 1e-30 }
  0xe9   : > { %v1477_v8 = vpack.c.bf16 %v862_v56, %v861_v51  ;;  %v622_v5 = vsel %vm621_vm8, %v2536_v4, %v618_v9  ;;  %v607_v50 = vsub.f32 1.5, %v606_v3  ;;  %vm448_vm10 = vcmp.gt.f32.partialorder %v2479_v10, 1e-10 }
  0xea   : > { %v595_v21 = vmul.f32 %v2595_v48, %v594_v22  ;;  %v1717_v39 = vpop.eup %1716  ;;  %v834_v29 = vsel %vm450_vm3, %v622_v5, 100000.0  ;;  %vm609_vm11 = vweird.f32 %v2511_v1  ;;  %v645_v34 = vmul.f32 %v2602_v60, %v644_v14 }
  0xeb   : > { %1720 = vrsqrt.f32 %v2620_v55  ;;  %v863_v35 = vmul.f32 %v831_v13, %v2239_v12  ;;  %1541 = vst [vmem:[#allocation2 + $0x18] sm:$0xff] %v1477_v8   ;;  %v608_v4 = vmul.f32 %v2555_v52, %v607_v50  ;;  %v634_v28 = vmul.f32 %v1717_v39, %v2568_v17  ;;  %vm611_vm12 = vmor %vm609_vm11, %vm610_vm9 }
  0xec   : > { %v596_v0 = vmul.f32 0.5, %v595_v21  ;;  %v1719_v41 = vpop.eup %1718  ;;  %v866_v45 = vmul.f32 %v834_v29, %v2254_v18  ;;  %vm599_vm13 = vweird.f32 %v2532_v63  ;;  %vm600_vm14 = vweird.f32 %v2595_v48  ;;  %v2645_v16 = vpop.xlane.xlu2 %415 }
  0xed   : > { %v2641_v47 = vmax.f32 %v2608_v2, 1e-30  ;;  %v612_v12 = vsel %vm611_vm12, %v2555_v52, %v608_v4  ;;  %v635_v54 = vmul.f32 %v1717_v39, %v634_v28  ;;  %v624_v23 = vmul.f32 %v1719_v41, %v2571_v15  ;;  %vm601_vm1 = vmor %vm599_vm13, %vm600_vm14  ;;  %v2665_v9 = vpop.xlane.xlu1 %413  ;;  %v2672_v13 = vpop.xlane.xlu0 %411 }
  0xee   : > { %v597_v1 = vsub.f32 1.5, %v596_v0  ;;  %v833_v18 = vsel %vm449_vm7, %v612_v12, 100000.0  ;;  %v646_v53 = vmul.f32 0.5, %v645_v34  ;;  %vm649_vm15 = vweird.f32 %v2540_v27 }
  0xef   : > { %1722 = vrsqrt.f32 %v2641_v47  ;;  %v865_v46 = vmul.f32 %v833_v18, %v2257_v19  ;;  %v636_v40 = vmul.f32 0.5, %v635_v54  ;;  %v625_v52 = vmul.f32 %v1719_v41, %v624_v23 }
  0xf0   : > { %v598_v57 = vmul.f32 %v2595_v48, %v597_v1  ;;  %vm452_vm2 = vcmp.gt.f32.partialorder %v2534_v61, 1e-10  ;;  %vm640_vm3 = vweird.f32 %v1717_v39  ;;  %vm451_vm0 = vcmp.gt.f32.partialorder %v2542_v33, 1e-10 }
  0xf1   : > { %v2653_v59 = vpop.eup %1720  ;;  %v2662_v62 = vmax.f32 %v2622_v11, 1e-30  ;;  %v1487_v19 = vpack.c.bf16 %v866_v45, %v865_v46  ;;  %v637_v58 = vsub.f32 1.5, %v636_v40  ;;  %v626_v51 = vmul.f32 0.5, %v625_v52 }
  0xf2   : > { %v602_v56 = vsel %vm601_vm1, %v2595_v48, %v598_v57  ;;  %v647_v63 = vsub.f32 1.5, %v646_v53  ;;  %vm639_vm4 = vweird.f32 %v2568_v17  ;;  %v674_v22 = vmul.f32 %v2653_v59, %v2620_v55 }
  0xf3   : > { %v832_v3 = vsel %vm448_vm10, %v602_v56, 100000.0  ;;  %1543 = vst [vmem:[#allocation2 + $0x68] sm:$0xff] %v1487_v19   ;;  %v638_v8 = vmul.f32 %v1717_v39, %v637_v58  ;;  %v627_v48 = vsub.f32 1.5, %v626_v51  ;;  %vm630_vm5 = vweird.f32 %v1719_v41  ;;  %vm641_vm7 = vmor %vm639_vm4, %vm640_vm3 }
  0xf4   : > { %v864_v14 = vmul.f32 %v832_v3, %v2260_v20  ;;  %vm650_vm6 = vweird.f32 %v2602_v60  ;;  %vm629_vm8 = vweird.f32 %v2571_v15  ;;  %v675_v10 = vmul.f32 %v2653_v59, %v674_v22 }
  0xf5   : > { %v1723_v5 = vpop.eup %1722  ;;  %1724 = vrsqrt.f32 %v2662_v62  ;;  %v642_v50 = vsel %vm641_vm7, %v1717_v39, %v638_v8  ;;  %v628_v21 = vmul.f32 %v1719_v41, %v627_v48  ;;  %v648_v20 = vmul.f32 %v2602_v60, %v647_v63  ;;  %vm631_vm9 = vmor %vm629_vm8, %vm630_vm5  ;;  %v2689_v39 = vpop.xlane.xlu2 %421 }
  0xf6   : > { %v1482_v17 = vpack.c.bf16 %v864_v14, %v863_v35  ;;  %v664_v29 = vmul.f32 %v1723_v5, %v2641_v47  ;;  %v836_v34 = vsel %vm452_vm2, %v642_v50, 100000.0  ;;  %v676_v4 = vmul.f32 0.5, %v675_v10  ;;  %vm2701_vm12 = vmor %vm649_vm15, %vm650_vm6  ;;  %v2716_v53 = vpop.xlane.xlu1 %419  ;;  %v2726_v40 = vpop.xlane.xlu0 %417 }
  0xf7   : > { %vm679_vm10 = vweird.f32 %v2620_v55  ;;  %v868_v15 = vmul.f32 %v836_v34, %v2272_v25  ;;  %v632_v0 = vsel %vm631_vm9, %v1719_v41, %v628_v21  ;;  %v2687_v35 = vmax.f32 %v2645_v16, 1e-30 }
  0xf8   : > { %1542 = vst [vmem:[#allocation2 + $0x50] sm:$0xff] %v1482_v17   ;;  %v665_v28 = vmul.f32 %v1723_v5, %v664_v29  ;;  %v835_v45 = vsel %vm451_vm0, %v632_v0, 100000.0  ;;  %v677_v12 = vsub.f32 1.5, %v676_v4  ;;  %vm680_vm11 = vweird.f32 %v2653_v59 }
  0xf9   : > { %v2695_v61 = vmax.f32 %v2665_v9, 1e-30  ;;  %v867_v41 = vmul.f32 %v835_v45, %v2275_v26  ;;  %1726 = vrsqrt.f32 %v2687_v35  ;;  %vm453_vm13 = vcmp.gt.f32.partialorder %v2513_v6, 1e-10  ;;  %vm681_vm14 = vmor %vm679_vm10, %vm680_vm11 }
  0xfa   : > { %v666_v1 = vmul.f32 0.5, %v665_v28  ;;  %v652_v54 = vsel %vm2701_vm12, %v2602_v60, %v648_v20  ;;  %v678_v23 = vmul.f32 %v2653_v59, %v677_v12  ;;  %vm670_vm15 = vweird.f32 %v1723_v5 }
  0xfb   : > { %v1725_v33 = vpop.eup %1724  ;;  %1728 = vrsqrt.f32 %v2695_v61  ;;  %v1492_v27 = vpack.c.bf16 %v868_v15, %v867_v41  ;;  %vm456_vm1 = vcmp.gt.f32.partialorder %v2579_v7, 1e-10  ;;  %v2721_v60 = vmax.f32 %v2672_v13, 1e-30 }
  0xfc   : > { %v667_v18 = vsub.f32 1.5, %v666_v1  ;;  %v654_v26 = vmul.f32 %v1725_v33, %v2662_v62  ;;  %v682_v46 = vsel %vm681_vm14, %v2653_v59, %v678_v23  ;;  %v2724_v57 = vmax.f32 %v2689_v39, 1e-30 }
  0xfd   : > { %1544 = vst [vmem:[#allocation2 + $0x8] sm:$0xff] %v1492_v27   ;;  %v840_v55 = vsel %vm456_vm1, %v682_v46, 100000.0  ;;  %vm669_vm2 = vweird.f32 %v2641_v47  ;;  %v837_v56 = vsel %vm453_vm13, %v652_v54, 100000.0  ;;  %vm455_vm3 = vcmp.gt.f32.partialorder %v2608_v2, 1e-10  ;;  %v2746_v14 = vpop.xlane.xlu2 %427 }
  0xfe   : > { %v668_v52 = vmul.f32 %v1723_v5, %v667_v18  ;;  %v655_v19 = vmul.f32 %v1725_v33, %v654_v26  ;;  %v872_v7 = vmul.f32 %v840_v55, %v2284_v30  ;;  %vm671_vm0 = vmor %vm669_vm2, %vm670_vm15  ;;  %1730 = vrsqrt.f32 %v2721_v60  ;;  %v2767_v4 = vpop.xlane.xlu1 %425  ;;  %v2774_v28 = vpop.xlane.xlu0 %423 }
  0xff   : > { %v2735_v59 = vpop.eup %1726  ;;  %1732 = vrsqrt.f32 %v2724_v57  ;;  %v2739_v47 = vmax.f32 %v2716_v53, 1e-30  ;;  %vm454_vm4 = vcmp.gt.f32.partialorder %v2622_v11, 1e-10  ;;  %vm660_vm5 = vweird.f32 %v1725_v33 }
 0x100   : > { %v672_v58 = vsel %vm671_vm0, %v1723_v5, %v668_v52  ;;  %v656_v51 = vmul.f32 0.5, %v655_v19  ;;  %v704_v30 = vmul.f32 %v2735_v59, %v2687_v35  ;;  %v869_v8 = vmul.f32 %v837_v56, %v2269_v24 }
 0x101   : > { %v1729_v3 = vpop.eup %1728  ;;  %v839_v6 = vsel %vm455_vm3, %v672_v58, 100000.0  ;;  %1734 = vrsqrt.f32 %v2739_v47  ;;  %v2752_v5 = vmax.f32 %v2726_v40, 1e-30  ;;  %vm659_vm6 = vweird.f32 %v2662_v62 }
 0x102   : > { %v871_v2 = vmul.f32 %v839_v6, %v2287_v31  ;;  %v657_v63 = vsub.f32 1.5, %v656_v51  ;;  %v694_v22 = vmul.f32 %v1729_v3, %v2695_v61  ;;  %v705_v48 = vmul.f32 %v2735_v59, %v704_v30  ;;  %vm661_vm7 = vmor %vm659_vm6, %vm660_vm5 }
 0x103   : > { %vm458_vm8 = vcmp.gt.f32.partialorder %v2665_v9, 1e-10  ;;  %1736 = vrsqrt.f32 %v2752_v5  ;;  %v2760_v24 = vmax.f32 %v2746_v14, 1e-30  ;;  %vm709_vm9 = vweird.f32 %v2687_v35 }
 0x104   : > { %v1502_v10 = vpack.c.bf16 %v872_v7, %v871_v2  ;;  %v658_v17 = vmul.f32 %v1725_v33, %v657_v63  ;;  %v695_v31 = vmul.f32 %v1729_v3, %v694_v22  ;;  %v2755_v50 = vpop.eup %1730  ;;  %v706_v21 = vmul.f32 0.5, %v705_v48 }
 0x105   : > { %v2762_v29 = vpop.eup %1732  ;;  %v684_v62 = vmul.f32 %v2755_v50, %v2721_v60  ;;  %vm699_vm10 = vweird.f32 %v2695_v61  ;;  %vm700_vm11 = vweird.f32 %v1729_v3  ;;  %1738 = vrsqrt.f32 %v2760_v24 }
 0x106   : > { %1546 = vst [vmem:[#allocation2 + $0x40] sm:$0xff] %v1502_v10   ;;  %v662_v20 = vsel %vm661_vm7, %v1725_v33, %v658_v17  ;;  %v696_v34 = vmul.f32 0.5, %v695_v31  ;;  %v734_v0 = vmul.f32 %v2762_v29, %v2724_v57  ;;  %v707_v1 = vsub.f32 1.5, %v706_v21  ;;  %vm701_vm14 = vmor %vm699_vm10, %vm700_vm11  ;;  %v2836_v10 = vpop.xlane.xlu2 %433  ;;  %v2838_v17 = vpop.xlane.xlu0 %429 }
 0x107   : > { %v838_v15 = vsel %vm454_vm4, %v662_v20, 100000.0  ;;  %v685_v25 = vmul.f32 %v2755_v50, %v684_v62  ;;  %v2779_v41 = vpop.eup %1734  ;;  %vm457_vm12 = vcmp.gt.f32.partialorder %v2672_v13, 1e-10  ;;  %vm462_vm13 = vcmp.gt.f32.partialorder %v2689_v39, 1e-10 }
 0x108   : > { %v870_v45 = vmul.f32 %v838_v15, %v2290_v32  ;;  %v697_v12 = vsub.f32 1.5, %v696_v34  ;;  %v735_v11 = vmul.f32 %v2762_v29, %v734_v0  ;;  %v724_v32 = vmul.f32 %v2779_v41, %v2739_v47 }
 0x109   : > { %v686_v23 = vmul.f32 0.5, %v685_v25  ;;  %v2786_v27 = vpop.eup %1736  ;;  %vm689_vm15 = vweird.f32 %v2721_v60  ;;  %vm690_vm1 = vweird.f32 %v2755_v50  ;;  %vm739_vm2 = vweird.f32 %v2724_v57  ;;  %v2824_v60 = vpop.xlane.xlu1 %431 }
 0x10a   : > { %v1497_v33 = vpack.c.bf16 %v870_v45, %v869_v8  ;;  %v698_v54 = vmul.f32 %v1729_v3, %v697_v12  ;;  %v736_v18 = vmul.f32 0.5, %v735_v11  ;;  %vm461_vm3 = vcmp.gt.f32.partialorder %v2716_v53, 1e-10  ;;  %vm691_vm6 = vmor %vm689_vm15, %vm690_vm1 }
 0x10b   : > { %v687_v46 = vsub.f32 1.5, %v686_v23  ;;  %v725_v55 = vmul.f32 %v2779_v41, %v724_v32  ;;  %v2797_v52 = vmax.f32 %v2767_v4, 1e-30  ;;  %vm459_vm0 = vcmp.gt.f32.partialorder %v2645_v16, 1e-10  ;;  %v2805_v7 = vpop.eup %1738 }
 0x10c   : > { %1545 = vst [vmem:[#allocation2 + $0x48] sm:$0xff] %v1497_v33   ;;  %v702_v26 = vsel %vm701_vm14, %v1729_v3, %v698_v54  ;;  %v737_v19 = vsub.f32 1.5, %v736_v18  ;;  %vm740_vm4 = vweird.f32 %v2762_v29  ;;  %v714_v56 = vmul.f32 %v2786_v27, %v2752_v5 }
 0x10d   : > { %v842_v61 = vsel %vm458_vm8, %v702_v26, 100000.0  ;;  %v708_v58 = vmul.f32 %v2735_v59, %v707_v1  ;;  %vm710_vm5 = vweird.f32 %v2735_v59  ;;  %v688_v51 = vmul.f32 %v2755_v50, %v687_v46  ;;  %vm741_vm8 = vmor %vm739_vm2, %vm740_vm4 }
 0x10e   : > { %v726_v3 = vmul.f32 0.5, %v725_v55  ;;  %v738_v9 = vmul.f32 %v2762_v29, %v737_v19  ;;  %vm730_vm7 = vweird.f32 %v2779_v41  ;;  %v715_v6 = vmul.f32 %v2786_v27, %v714_v56  ;;  %vm2828_vm10 = vmor %vm709_vm9, %vm710_vm5  ;;  %v2884_v32 = vpop.xlane.xlu0 %435 }
 0x10f   : > { %v764_v30 = vmul.f32 %v2805_v7, %v2760_v24  ;;  %v874_v2 = vmul.f32 %v842_v61, %v2302_v37  ;;  %v692_v63 = vsel %vm691_vm6, %v2755_v50, %v688_v51  ;;  %1740 = vrsqrt.f32 %v2797_v52 }
 0x110   : > { %v727_v22 = vsub.f32 1.5, %v726_v3  ;;  %v841_v48 = vsel %vm457_vm12, %v692_v63, 100000.0  ;;  %v742_v37 = vsel %vm741_vm8, %v2762_v29, %v738_v9  ;;  %vm729_vm11 = vweird.f32 %v2739_v47 }
 0x111   : > { %v716_v57 = vmul.f32 0.5, %v715_v6  ;;  %v712_v35 = vsel %vm2828_vm10, %v2735_v59, %v708_v58  ;;  %v873_v31 = vmul.f32 %v841_v48, %v2305_v38  ;;  %v846_v50 = vsel %vm462_vm13, %v742_v37, 100000.0  ;;  %vm731_vm9 = vmor %vm729_vm11, %vm730_vm7  ;;  %v2882_v11 = vpop.xlane.xlu1 %437 }
 0x112   : > { %v728_v13 = vmul.f32 %v2779_v41, %v727_v22  ;;  %vm720_vm12 = vweird.f32 %v2786_v27  ;;  %v765_v21 = vmul.f32 %v2805_v7, %v764_v30  ;;  %v2852_v29 = vmax.f32 %v2774_v28, 1e-30 }
 0x113   : > { %v717_v47 = vsub.f32 1.5, %v716_v57  ;;  %v1507_v20 = vpack.c.bf16 %v874_v2, %v873_v31  ;;  %v878_v59 = vmul.f32 %v846_v50, %v2314_v42  ;;  %v2857_v39 = vmax.f32 %v2836_v10, 1e-30 }
 0x114   : > { %v732_v38 = vsel %vm731_vm9, %v2779_v41, %v728_v13  ;;  %vm719_vm13 = vweird.f32 %v2752_v5  ;;  %1742 = vrsqrt.f32 %v2852_v29  ;;  %v843_v0 = vsel %vm459_vm0, %v712_v35, 100000.0 }
 0x115   : > { %v845_v34 = vsel %vm461_vm3, %v732_v38, 100000.0  ;;  %v718_v62 = vmul.f32 %v2786_v27, %v717_v47  ;;  %v1741_v15 = vpop.eup %1740  ;;  %1547 = vst [vmem:[#allocation2 + $0x20] sm:$0xff] %v1507_v20   ;;  %vm721_vm14 = vmor %vm719_vm13, %vm720_vm12  ;;  %1744 = vrsqrt.f32 %v2857_v39  ;;  %vm460_vm15 = vcmp.gt.f32.partialorder %v2726_v40, 1e-10 }
 0x116   : > { %v877_v42 = vmul.f32 %v845_v34, %v2317_v43  ;;  %v754_v5 = vmul.f32 %v1741_v15, %v2797_v52  ;;  %v766_v25 = vmul.f32 0.5, %v765_v21  ;;  %v2874_v16 = vmax.f32 %v2824_v60, 1e-30  ;;  %v1754_v34 = vld [vmem:[%s2176_s20 + $0xc0] sm:$0xff] }
 0x117   : > { %v722_v53 = vsel %vm721_vm14, %v2786_v27, %v718_v62  ;;  %v875_v41 = vmul.f32 %v843_v0, %v2299_v36  ;;  %v2880_v40 = vmax.f32 %v2838_v17, 1e-30  ;;  %vm760_vm1 = vweird.f32 %v1741_v15 }
 0x118   : > { %v1517_v45 = vpack.c.bf16 %v878_v59, %v877_v42  ;;  %v844_v12 = vsel %vm460_vm15, %v722_v53, 100000.0  ;;  %v755_v1 = vmul.f32 %v1741_v15, %v754_v5  ;;  %1746 = vrsqrt.f32 %v2874_v16 }
 0x119   : > { %v876_v43 = vmul.f32 %v844_v12, %v2320_v44  ;;  %v767_v18 = vsub.f32 1.5, %v766_v25  ;;  %1748 = vrsqrt.f32 %v2880_v40  ;;  %v2890_v46 = vmax.f32 %v2882_v11, 1e-30 }
 0x11a   : > { %1549 = vst [vmem:[#allocation2 + $0x38] sm:$0xff] %v1517_v45   ;;  %v1743_v33 = vpop.eup %1742  ;;  %v756_v23 = vmul.f32 0.5, %v755_v1  ;;  %vm769_vm2 = vweird.f32 %v2760_v24  ;;  %vm464_vm3 = vcmp.gt.f32.partialorder %v2767_v4, 1e-10  ;;  %v2895_v61 = vmax.f32 %v2884_v32, 1e-30 }
 0x11b   : > { %v1512_v54 = vpack.c.bf16 %v876_v43, %v875_v41  ;;  %v1745_v27 = vpop.eup %1744  ;;  %v744_v36 = vmul.f32 %v1743_v33, %v2852_v29  ;;  %vm759_vm0 = vweird.f32 %v2797_v52  ;;  %1750 = vrsqrt.f32 %v2890_v46  ;;  %v1755_v45 = vld [vmem:[%s2176_s20 + $0xe8] sm:$0xff]  ;;  %v1756_v1 = vld [vmem:[%s2176_s20 + $0xe0] sm:$0xff] }
 0x11c   : > { %v757_v44 = vsub.f32 1.5, %v756_v23  ;;  %v794_v26 = vmul.f32 %v1745_v27, %v2857_v39  ;;  %vm770_vm4 = vweird.f32 %v2805_v7  ;;  %vm761_vm5 = vmor %vm759_vm0, %vm760_vm1  ;;  %vm463_vm6 = vcmp.gt.f32.partialorder %v2774_v28, 1e-10 }
 0x11d   : > { %1548 = vst [vmem:[#allocation2 + $0x10] sm:$0xff] %v1512_v54   ;;  %v745_v55 = vmul.f32 %v1743_v33, %v744_v36  ;;  %1752 = vrsqrt.f32 %v2895_v61  ;;  %vm465_vm7 = vcmp.gt.f32.partialorder %v2746_v14, 1e-10  ;;  %v768_v3 = vmul.f32 %v2805_v7, %v767_v18  ;;  %vm2913_vm9 = vmor %vm769_vm2, %vm770_vm4 }
 0x11e   : > { %v758_v19 = vmul.f32 %v1741_v15, %v757_v44  ;;  %v795_v56 = vmul.f32 %v1745_v27, %v794_v26  ;;  %v1747_v58 = vpop.eup %1746  ;;  %vm750_vm8 = vweird.f32 %v1743_v33  ;;  %vm799_vm10 = vweird.f32 %v2857_v39  ;;  %v1758_v44 = vld [vmem:[%s2176_s20 + $0xd8] sm:$0xff] }
 0x11f   : > { %v746_v51 = vmul.f32 0.5, %v745_v55  ;;  %v784_v52 = vmul.f32 %v1747_v58, %v2874_v16  ;;  %v1749_v30 = vpop.eup %1748  ;;  %vm800_vm11 = vweird.f32 %v1745_v27  ;;  %vm749_vm12 = vweird.f32 %v2852_v29 }
 0x120   : > { %v762_v9 = vsel %vm761_vm5, %v1741_v15, %v758_v19  ;;  %v796_v6 = vmul.f32 0.5, %v795_v56  ;;  %v774_v48 = vmul.f32 %v1749_v30, %v2880_v40  ;;  %vm468_vm13 = vcmp.gt.f32.partialorder %v2836_v10, 1e-10  ;;  %vm751_vm15 = vmor %vm749_vm12, %vm750_vm8  ;;  %v1759_v56 = vld [vmem:[%s2176_s20 + $0xf8] sm:$0xff] }
 0x121   : > { %v747_v2 = vsub.f32 1.5, %v746_v51  ;;  %v848_v63 = vsel %vm464_vm3, %v762_v9, 100000.0  ;;  %v785_v8 = vmul.f32 %v1747_v58, %v784_v52  ;;  %vm467_vm14 = vcmp.gt.f32.partialorder %v2824_v60, 1e-10  ;;  %v2920_v4 = vpop.eup %1750  ;;  %vm801_vm1 = vmor %vm799_vm10, %vm800_vm11  ;;  %v1757_v60 = vld [vmem:[%s2176_s20 + $0xd0] sm:$0xff] }
 0x122   : > { %v797_v22 = vsub.f32 1.5, %v796_v6  ;;  %v772_v35 = vsel %vm2913_vm9, %v2805_v7, %v768_v3  ;;  %v775_v50 = vmul.f32 %v1749_v30, %v774_v48  ;;  %v880_v47 = vmul.f32 %v848_v63, %v2330_v49  ;;  %v1760_v9 = vld [vmem:[%s2176_s20 + $0xf0] sm:$0xff] }
 0x123   : > { %v748_v57 = vmul.f32 %v1743_v33, %v747_v2  ;;  %v786_v31 = vmul.f32 0.5, %v785_v8  ;;  %v2925_v13 = vpop.eup %1752  ;;  %vm790_vm2 = vweird.f32 %v1747_v58  ;;  %v814_v29 = vmul.f32 %v2920_v4, %v2890_v46 }
 0x124   : > { %v798_v24 = vmul.f32 %v1745_v27, %v797_v22  ;;  %v776_v38 = vmul.f32 0.5, %v775_v50  ;;  %v804_v39 = vmul.f32 %v2925_v13, %v2895_v61  ;;  %vm789_vm3 = vweird.f32 %v2874_v16 }
 0x125   : > { %v752_v21 = vsel %vm751_vm15, %v1743_v33, %v748_v57  ;;  %v787_v59 = vsub.f32 1.5, %v786_v31  ;;  %v815_v15 = vmul.f32 %v2920_v4, %v814_v29  ;;  %vm780_vm0 = vweird.f32 %v1749_v30  ;;  %vm791_vm4 = vmor %vm789_vm3, %vm790_vm2 }
 0x126   : > { %v847_v7 = vsel %vm463_vm6, %v752_v21, 100000.0  ;;  %v802_v20 = vsel %vm801_vm1, %v1745_v27, %v798_v24  ;;  %v777_v42 = vsub.f32 1.5, %v776_v38  ;;  %v849_v28 = vsel %vm465_vm7, %v772_v35, 100000.0 }
 0x127   : > { %v879_v62 = vmul.f32 %v1754_v34, %v847_v7  ;;  %v852_v49 = vsel %vm468_vm13, %v802_v20, 100000.0  ;;  %v788_v0 = vmul.f32 %v1747_v58, %v787_v59  ;;  %v816_v5 = vmul.f32 0.5, %v815_v15 }
 0x128   : > { %v805_v10 = vmul.f32 %v2925_v13, %v804_v39  ;;  %v884_v12 = vmul.f32 %v1755_v45, %v852_v49  ;;  %v778_v41 = vmul.f32 %v1749_v30, %v777_v42  ;;  %vm779_vm5 = vweird.f32 %v2880_v40 }
 0x129   : > { %v1522_v53 = vpack.c.bf16 %v880_v47, %v879_v62  ;;  %v792_v25 = vsel %vm791_vm4, %v1747_v58, %v788_v0  ;;  %vm781_vm6 = vmor %vm779_vm5, %vm780_vm0  ;;  %v817_v14 = vsub.f32 1.5, %v816_v5  ;;  %vm820_vm7 = vweird.f32 %v2920_v4 }
 0x12a   : > { %v851_v16 = vsel %vm467_vm14, %v792_v25, 100000.0  ;;  %v806_v43 = vmul.f32 0.5, %v805_v10  ;;  %vm466_vm8 = vcmp.gt.f32.partialorder %v2838_v17, 1e-10  ;;  %v782_v54 = vsel %vm781_vm6, %v1749_v30, %v778_v41 }
 0x12b   : > { %1550 = vst [vmem:[#allocation2 + $0x60] sm:$0xff] %v1522_v53   ;;  %v883_v33 = vmul.f32 %v1756_v1, %v851_v16  ;;  %vm819_vm10 = vweird.f32 %v2890_v46  ;;  %v850_v23 = vsel %vm466_vm8, %v782_v54, 100000.0  ;;  %v818_v40 = vmul.f32 %v2920_v4, %v817_v14 }
 0x12c   : > { %v807_v27 = vsub.f32 1.5, %v806_v43  ;;  %vm810_vm11 = vweird.f32 %v2925_v13  ;;  %v881_v18 = vmul.f32 %v1757_v60, %v849_v28  ;;  %v882_v26 = vmul.f32 %v1758_v44, %v850_v23  ;;  %vm821_vm9 = vmor %vm819_vm10, %vm820_vm7 }
 0x12d   : > { %v1532_v36 = vpack.c.bf16 %v884_v12, %v883_v33  ;;  %vm470_vm12 = vcmp.gt.f32.partialorder %v2882_v11, 1e-10  ;;  %v822_v17 = vsel %vm821_vm9, %v2920_v4, %v818_v40  ;;  %vm809_vm13 = vweird.f32 %v2895_v61 }
 0x12e   : > { %v808_v46 = vmul.f32 %v2925_v13, %v807_v27  ;;  %v1527_v55 = vpack.c.bf16 %v882_v26, %v881_v18  ;;  %v854_v19 = vsel %vm470_vm12, %v822_v17, 100000.0  ;;  %vm811_vm14 = vmor %vm809_vm13, %vm810_vm11  ;;  %vm469_vm15 = vcmp.gt.f32.partialorder %v2884_v32, 1e-10 }
 0x12f   : > { %1552 = vst [vmem:[#allocation2 + $0x78] sm:$0xff] %v1532_v36   ;;  %v886_v58 = vmul.f32 %v1759_v56, %v854_v19 }
 0x130   : > { %v812_v51 = vsel %vm811_vm14, %v2925_v13, %v808_v46  ;;  %1551 = vst [vmem:[#allocation2 + $0x70] sm:$0xff] %v1527_v55  }
 0x131   : > { %v853_v3 = vsel %vm469_vm15, %v812_v51, 100000.0 }
 0x132   : > { %v885_v11 = vmul.f32 %v1760_v9, %v853_v3 }
 0x134   : > { %v1537_v6 = vpack.c.bf16 %v886_v58, %v885_v11 }
 0x136   : > { %1553 = vst [vmem:[#allocation2 + $0x28] sm:$0xff] %v1537_v6  }
 0x137 PF: > { %v2969_v61 = vld [vmem:[%s2198_s12] sm:$0xff]  ;;  %v1450_v52 = vld [vmem:[#allocation2 + $0x48] sm:$0xff]  ;;  %v1457_v8 = vld [vmem:[#allocation2 + $0x78] sm:$0xff]  ;;  %v1983_v59 = vmov 0   ;;  %v1984_v55 = vmov 0.0   ;;  %v1182_v6 = vlaneseq  ;;  %s1435_s20 = sshll.u32 %s1967_s25, 8 }
 0x138   : > { %v952_v30 = vmul.f32 %v2969_v61, %v2969_v61  ;;  %1098 = vmatpush.bf16.xpose.msra.mxu0 %v1450_v52  ;;  %v2975_v32 = vld [vmem:[%s258_s5] sm:$0xff]  ;;  %v1456_v37 = vld [vmem:[#allocation2 + $0x70] sm:$0xff]  ;;  %v1446_v35 = vld [vmem:[#allocation2 + $0x18] sm:$0xff]  ;;  %1761 = vset.pattern.permute.xlu1 %v1983_v59  ;;  %s1437_s21 = sshll.u32 %s1967_s25, 1  ;;  %s1438_s1 = sshll.u32 %s1963_s24, 2 }
 0x139   : > { %v1449_v63 = vld [vmem:[#allocation2 + $0x8] sm:$0xff]  ;;  %v1129_v22 = vmul.f32 %v2975_v32, %v2975_v32  ;;  %v1447_v57 = vld [vmem:[#allocation2 + $0x50] sm:$0xff]  ;;  %v1455_v4 = vld [vmem:[#allocation2 + $0x60] sm:$0xff]  ;;  %1762 = vset.pattern.permute.xlu0 %v1983_v59  ;;  %s1213_s29 = sadd.s32 %s1438_s1, %s1437_s21  ;;  %s3101_s5 = sld [smem:[#allocation21_spill]] }
 0x13a   : > { %953 = vadd.xlane.f32.xlu0 %v952_v30  ;;  %v1448_v48 = vld [vmem:[#allocation2 + $0x68] sm:$0xff]  ;;  %v1454_v24 = vld [vmem:[#allocation2 + $0x38] sm:$0xff]  ;;  %v1453_v50 = vld [vmem:[#allocation2 + $0x10] sm:$0xff]  ;;  %s1439_s27 = sshll.u32 %s1213_s29, 3  ;;  %s1217_s7 = sshll.u32 %s2205_s6, 4  ;;  %s1218_s7 = int_to_ptr.vmem [resolvable:$true] %s1217_s7 }
 0x13b   : > { %v1445_v31 = vld [vmem:[#allocation2 + $0x58] sm:$0xff]  ;;  %v1444_v13 = vld [vmem:[#allocation2] sm:$0xff]  ;;  %v1443_v21 = vld [vmem:[#allocation2 + $0x30] sm:$0xff]  ;;  %s1202_s9 = scalar_lea.sflag [#allocation5], %s294_s23 }
 0x13c   : > { %v1452_v47 = vld [vmem:[#allocation2 + $0x20] sm:$0xff] }
 0x13d   : > { %v1458_v2 = vld [vmem:[#allocation2 + $0x28] sm:$0xff]  ;;  %v1451_v29 = vld [vmem:[#allocation2 + $0x40] sm:$0xff] }
 0x13e   : > { %1111 = vmatpush.bf16.xpose.msra.mxu1 %v1458_v2  ;;  %v1189_v23 = vld [vmem:[%s2203_s13] sm:$0xff]  ;;  %v1183_v2 = vand.u32 127, %v1182_v6 }
 0x13f   : > { %s1215_s26 = scalar_lea.hbm %s3101_s5, %s1439_s27  ;;  %s1849_s13 = scalar_lea.hbm %s3101_s5, 64 }
 0x140   : > { %1099 = vmatpush.bf16.xpose.msra.mxu0 %v1449_v63  ;;  %s1219_s8 = sshll.u32 %s1215_s26, 4  ;;  %s1220_s8 = int_to_ptr.hbm [resolvable:$true] %s1219_s8 }
 0x141   : > { %s1843_s11 = sshra.s32 %s1220_s8, 4  ;;  %s1844_s11 = int_to_ptr.hbm [resolvable:$true] %s1843_s11 }
 0x142   : > { %1130 = vadd.xlane.f32.xlu0 %v1129_v22  ;;  %s1845_s12 = scalar_lea.hbm %s1844_s11, 16  ;;  %p1850_p7 = scmp.lt.s32.totalorder %s1844_s11, %s3101_s5 }
 0x143   : > { %p1846_p11 = scmp.ne.s32.totalorder %s1844_s11, %s1845_s12  ;;  %p1851_p9 = scmp.lt.s32.totalorder %s1849_s13, %s1845_s12 }
 0x145   : > { %p1847_p0 = pnand %p1846_p11, %p2153_p2  ;;  %p1852_p12 = por %p1851_p9, %p1850_p7 }
 0x146   : > { %1112 = vmatpush.bf16.xpose.msra.mxu1 %v1457_v8 }
 0x147   : > { %p1848_p4 = pneg %p1847_p0 }
 0x148   : > { %1100 = vmatpush.bf16.xpose.msra.mxu0 %v1448_v48 }
 0x149   : > { %p1853_p13 = pnand %p1852_p12, %p1848_p4 }
 0x14e   : > { %1113 = vmatpush.bf16.xpose.msra.mxu1 %v1456_v37  ;;  %v1184_v37 = vadd.s32 128, %v1183_v2 }
 0x150   : > { %1101 = vmatpush.bf16.xpose.msra.mxu0 %v1447_v57 }
 0x156   : > { %1114 = vmatpush.bf16.xpose.msra.mxu1 %v1455_v4 }
 0x158   : > { %1102 = vmatpush.bf16.xpose.msra.mxu0 %v1446_v35  ;;  %v1186_v35 = vstv %s1435_s20 }
 0x15e   : > { %1115 = vmatpush.bf16.xpose.msra.mxu1 %v1454_v24 }
 0x160   : > { %1103 = vmatpush.bf16.xpose.msra.mxu0 %v1445_v31  ;;  %v1985_v31 = vmov -1.0  }
 0x166   : > { %1116 = vmatpush.bf16.xpose.msra.mxu1 %v1453_v50 }
 0x168   : > { %1104 = vmatpush.bf16.xpose.msra.mxu0 %v1444_v13  ;;  %v1187_v13 = vadd.s32 %v1186_v35, %v1183_v2 }
 0x16e   : > { %1117 = vmatpush.bf16.xpose.msra.mxu1 %v1452_v47  ;;  %v1188_v47 = vadd.s32 %v1186_v35, %v1184_v37 }
 0x170   : > { %1105 = vmatpush.bf16.xpose.msra.mxu0 %v1443_v21 }
 0x176   : > { %1118 = vmatpush.bf16.xpose.msra.mxu1 %v1451_v29 }
 0x1ad   : > { %v954_v7 = vpop.xlane.xlu0 %953 }
 0x1ae   : > { %v956_v20 = vmax.f32 %v954_v7, 1e-30  ;;  %vm955_vm0 = vcmp.gt.f32.partialorder %v954_v7, 1e-10 }
 0x1b0   : > { %1763 = vrsqrt.f32 %v956_v20  ;;  %vm963_vm2 = vweird.f32 %v956_v20 }
 0x1b5   : > { %v1131_v38 = vpop.xlane.xlu0 %1130 }
 0x1b6   : > { %v1764_v34 = vpop.eup %1763  ;;  %v1133_v62 = vmax.f32 %v1131_v38, 1e-30  ;;  %vm1132_vm7 = vcmp.gt.f32.partialorder %v1131_v38, 1e-10 }
 0x1b7   : > { %v958_v49 = vmul.f32 %v1764_v34, %v956_v20  ;;  %vm964_vm1 = vweird.f32 %v1764_v34 }
 0x1b8   : > { %1765 = vrsqrt.f32 %v1133_v62  ;;  %vm965_vm3 = vmor %vm963_vm2, %vm964_vm1  ;;  %vm1140_vm5 = vweird.f32 %v1133_v62 }
 0x1b9   : > { %v959_v15 = vmul.f32 %v1764_v34, %v958_v49 }
 0x1bb   : > { %v960_v39 = vmul.f32 0.5, %v959_v15 }
 0x1bd   : > { %v961_v0 = vsub.f32 1.5, %v960_v39 }
 0x1be   : > { %v1766_v42 = vpop.eup %1765 }
 0x1bf   : > { %v962_v28 = vmul.f32 %v1764_v34, %v961_v0  ;;  %v1135_v53 = vmul.f32 %v1766_v42, %v1133_v62  ;;  %vm1141_vm4 = vweird.f32 %v1766_v42 }
 0x1c0   : > { %vm1142_vm6 = vmor %vm1140_vm5, %vm1141_vm4 }
 0x1c1   : > { %v966_v5 = vsel %vm965_vm3, %v1764_v34, %v962_v28  ;;  %v1136_v10 = vmul.f32 %v1766_v42, %v1135_v53 }
 0x1c2   : > { %v967_v45 = vsel %vm955_vm0, %v966_v5, 100000.0 }
 0x1c3   : > { %v1137_v12 = vmul.f32 0.5, %v1136_v10  ;;  %v968_v25 = vmul.f32 %v967_v45, %v2969_v61 }
 0x1c5   : > { %v1138_v41 = vsub.f32 1.5, %v1137_v12  ;;  %v969_v16 = vpack.c.bf16 %v968_v25, %v968_v25 }
 0x1c7   : > { %v1139_v14 = vmul.f32 %v1766_v42, %v1138_v41  ;;  %1106 = vmatmul.bf16.vlgmr.msra.gmra.mxu0 %v969_v16  ;;  %1119 = vmatmul.bf16.vlgmr.msra.gmra.mxu1 %v969_v16 }
 0x1c9   : > { %v1143_v43 = vsel %vm1142_vm6, %v1766_v42, %v1139_v14 }
 0x1ca   : > { %v1144_v1 = vsel %vm1132_vm7, %v1143_v43, 100000.0 }
 0x1cb   : > { %v1145_v33 = vmul.f32 %v1144_v1, %v2975_v32 }
 0x1cd   : > { %v1146_v54 = vmul.f32 %v1145_v33, %v968_v25 }
 0x1cf   : > { %1147 = vadd.xlane.f32.xlu1 %v1146_v54 }
 0x1e8   : > { %1191 = vperm.xlu1 %1761, %v1189_v23  }
 0x242   : > { %v1148_v40 = vpop.xlane.xlu1 %1147 }
 0x243   : > { %v1433_v27 = vclamps-f32 %v1148_v40, 1.0 }
 0x244   : > { %v1107_v60 = vpop.f32.mrf.mxu0  ;;  %v1120_v18 = vpop.f32.mrf.mxu1 }
 0x245   : > { %v1151_v36 = vmul.f32 %v1433_v27, %v1433_v27  ;;  %vm1169_vm8 = vcmp.le.f32.partialorder %v1433_v27, -0.9553365  ;;  %v1166_v57 = vmul.f32 0.9553365, %v1433_v27  ;;  %v1431_v59 = vclamps-f32 %v1107_v60, 1.0 }
 0x246   : > { %v1170_v19 = vsel %vm1169_vm8, 1.0, %v1984_v55  ;;  %v1432_v38 = vclamps-f32 %v1120_v18, 1.0 }
 0x247   : > { %v1152_v44 = vsub.f32 1.0, %v1151_v36  ;;  %v1172_v56 = vmul.f32 0.5, %v1170_v19  ;;  %v1179_v29 = vmul.f32 2.0, %v1170_v19 }
 0x249   : > { %v1153_v26 = vmax.f32 %v1152_v44, 0.0  ;;  %v1173_v9 = vfloor.f32 %v1172_v56 }
 0x24b   : > { %1767 = vrsqrt.f32 %v1153_v26  ;;  %v1174_v52 = vmul.f32 2.0, %v1173_v9  ;;  %vm1161_vm10 = vcmp.eq.f32.partialorder %v1153_v26, inf  ;;  %v1164_v22 = vand.u32 2147483648, %v1153_v26 }
 0x24c   : > { %v1109_v17 = vpop.f32.mrf.mxu0  ;;  %v1122_v46 = vpop.f32.mrf.mxu1  ;;  %vm1163_vm11 = vcmp.eq.f32.partialorder %v1153_v26, 0.0 }
 0x24d   : > { %v1175_v63 = vsub.f32 %v1170_v19, %v1174_v52 }
 0x24f   : > { %vm1176_vm9 = vcmp.eq.f32.partialorder %v1175_v63, 0.0 }
 0x250   : > { %v1177_v50 = vsel %vm1176_vm9, 1.0, %v1985_v31 }
 0x251   : > { %v1768_v58 = vpop.eup %1767 }
 0x252   : > { %v1155_v51 = vmul.f32 %v1768_v58, %v1153_v26 }
 0x254   : > { %v1156_v3 = vmul.f32 %v1768_v58, %v1155_v51 }
 0x256   : > { %v1157_v11 = vmul.f32 0.5, %v1156_v3 }
 0x258   : > { %v1158_v61 = vsub.f32 1.5, %v1157_v11 }
 0x25a   : > { %v1159_v30 = vmul.f32 %v1768_v58, %v1158_v61  ;;  %v1192_v7 = vpop.permute.xlu1 %1191 }
 0x25b   : > { %vm1193_vm12 = vcmp.eq.s32.totalorder %v1187_v13, %v1192_v7  ;;  %vm1194_vm13 = vcmp.eq.s32.totalorder %v1188_v47, %v1192_v7 }
 0x25c   : > { %v1160_v32 = vmul.f32 %v1159_v30, %v1153_v26 }
 0x25e   : > { %v1162_v8 = vsel %vm1161_vm10, %v1153_v26, %v1160_v32 }
 0x25f   : > { %v1165_v48 = vsel %vm1163_vm11, %v1164_v22, %v1162_v8 }
 0x260   : > { %v1167_v4 = vmul.f32 0.29552022, %v1165_v48 }
 0x262   : > { %v1168_v24 = vsub.f32 %v1166_v57, %v1167_v4 }
 0x264   : > { %v1178_v21 = vmul.f32 %v1177_v50, %v1168_v24 }
 0x266   : > { %v1180_v20 = vsub.f32 %v1178_v21, %v1179_v29 }
 0x268   : > { %v1434_v34 = vadd.f32 -0.1, %v1180_v20 }
 0x26a   : > { %v1195_v62 = vsel %vm1193_vm12, %v1434_v34, %v1431_v59  ;;  %v1196_v49 = vsel %vm1194_vm13, %v1434_v34, %v1432_v38 }
 0x26b   : > { %v1197_v15 = vmul.f32 30.0, %v1195_v62  ;;  %v1198_v39 = vmul.f32 30.0, %v1196_v49 }
 0x26d   : > { %1199 = vst [vmem:[%s2205_s6] sm:$0xff] %v1197_v15 }
 0x26e   : > { %1200 = vst [vmem:[%s2205_s6 + $0x8] sm:$0xff] %v1198_v39 }
 0x26f   : > { %1856 = shalt.err (!%p1853_p13)
}
 0x270   : > { %1558 = dma.vmem_to_hbm [thread:$0]  (%p2153_p2), %s1218_s7, 256, %s1220_s8, %s1202_s9  }
 0x271 PF: > { %p1572_p10 = scmp.ge.s32.totalorder %s1979_s28, 2  ;;  %s1231_s23 = sand.u32 1, %s1927_s15  }
 0x272   : > { %s1232_s6 = scalar_lea.sflag [#allocation5], %s1231_s23 }
 0x273   : > { %p1568_p5 = pnand %p1572_p10, %p2163_p3 }
 0x275   : > { %p1569_p6 = pneg %p1568_p5 }
 0x277   : > { %1922 = dma.done.wait (%p1569_p6), %s1232_s6, 256  }
 0x278   : > { %1924 = vsyncadd (%p1569_p6), %s1232_s6, 4294967040  ;;  %s23_s28 = sadd.s32 1, %s1979_s28   ;;  %s3103_s30 = sld [smem:[#allocation12_spill]] }
 0x279   : > { %p3008_p1 = scmp.ge.s32.totalorder %s23_s28, 6   ;;  %s3104_s20 = sld [smem:[#allocation18_spill]] }
 0x27a   : > { %s3105_s29 = sld [smem:[#allocation13_spill]]  ;;  %s3111_s15 = smov %s1931_s16 }
 0x27b   : > { %s3106_s23 = sld [smem:[#allocation19_spill]]  ;;  %s3112_s16 = smov %s1935_s17 }
 0x27c   : > { %s3107_s24 = sld [smem:[#allocation14_spill]]  ;;  %s3113_s17 = smov %s2147_s4 }
 0x27d   : > { %s3108_s25 = sld [smem:[#allocation15_spill]]  ;;  %s3114_s18 = smov %s1943_s19 }
 0x27e   : > { %s3109_s26 = sld [smem:[#allocation16_spill]]  ;;  %s3115_s19 = smov %s3103_s30 }
 0x27f   : > { %s3110_s27 = sld [smem:[#allocation17_spill]]  ;;  %s3116_s21 = smov %s1955_s22 }
 0x280   : > { %s3117_s22 = smov %s3105_s29  ;;  %22 = sbr.rel (!%p3008_p1) target bundleno = 15 (0xf), region = 104 }
 0x285   :  { %1238 = vsyncpa [#allocation4], 1 }
 0x286   :  { %1240 = vsyncpa [#allocation4 + $0x1], 1 }
 0x287   :  { %1241 = vsyncpa [#allocation7], 1 }
 0x288   :  { %1243 = vsyncpa [#allocation7 + $0x1], 1 }
 0x289   :  { %1244 = vsyncpa [#allocation5], 1 }
 0x28a   :  { %1246 = vsyncpa [#allocation5 + $0x1], 1 }

</bundles_post_ra>
